<compile_context>
chip_gen: v6e
topology: v6e:2x2x1
jax: 0.10.0
libtpu: 0.0.40
codegen_flags: <defaults>
</compile_context>

<pallas_src>
import functools

import jax
import jax.numpy as jnp
from jax import lax
from jax.experimental import pallas as pl
from jax.experimental.pallas import tpu as pltpu


def _round_up(x, m):
    return ((x + m - 1) // m) * m


# --------------------------------------------------------------------------- #
# Kernel 1: conv (im2col matmul) + bias + ReLU + 2x2 max-pool + BatchNorm2d
#   patches: (K_pad, 4*Mp_pad) bf16  columns grouped by the 4 pool offsets,
#            within a group m = n*Hop*Wop + hi*Wop + wi, zero-padded columns/rows
#   w:       (O, K_pad)       bf16
#   b/g/bt:  (O, 1)           f32
#   out:     (O, Mp_pad)      f32   channel-major
# --------------------------------------------------------------------------- #
def _conv_pool_bn_kernel(p_ref, w_ref, b_ref, g_ref, bt_ref, o_ref, *, mp_pad, mp_valid):
    # One MXU matmul covering all 4 pool offsets, f32 accumulate.
    y = jnp.dot(w_ref[...], p_ref[...], preferred_element_type=jnp.float32)  # (O, 4*Mp_pad)
    y = jnp.maximum(y + b_ref[...], 0.0)                                     # bias + ReLU (f32)
    # 2x2 max-pool: max over the 4 static, lane-tile-aligned offset groups.
    x = jnp.maximum(jnp.maximum(y[:, 0:mp_pad], y[:, mp_pad:2 * mp_pad]),
                    jnp.maximum(y[:, 2 * mp_pad:3 * mp_pad], y[:, 3 * mp_pad:4 * mp_pad]))
    # Training-mode BatchNorm2d: per-channel biased stats over the valid columns.
    if mp_valid == mp_pad:
        mean = jnp.mean(x, axis=1, keepdims=True)
        xc = x - mean
        var = jnp.mean(xc * xc, axis=1, keepdims=True)
    else:
        mask = lax.broadcasted_iota(jnp.int32, x.shape, 1) < mp_valid
        inv_n = 1.0 / mp_valid
        mean = jnp.sum(jnp.where(mask, x, 0.0), axis=1, keepdims=True) * inv_n
        xc = x - mean
        var = jnp.sum(jnp.where(mask, xc * xc, 0.0), axis=1, keepdims=True) * inv_n
    o_ref[...] = xc * lax.rsqrt(var + 1e-5) * g_ref[...] + bt_ref[...]


def conv_pool_bn(patches, w, b, gamma, beta, *, mp_pad, mp_valid):
    k_pad, four_mp = patches.shape
    O = w.shape[0]
    kern = functools.partial(_conv_pool_bn_kernel, mp_pad=mp_pad, mp_valid=mp_valid)
    return pl.pallas_call(
        kern,
        grid=(1,),
        in_specs=[
            pl.BlockSpec((k_pad, four_mp), lambda i: (0, 0)),
            pl.BlockSpec((O, k_pad), lambda i: (0, 0)),
            pl.BlockSpec((O, 1), lambda i: (0, 0)),
            pl.BlockSpec((O, 1), lambda i: (0, 0)),
            pl.BlockSpec((O, 1), lambda i: (0, 0)),
        ],
        out_specs=pl.BlockSpec((O, mp_pad), lambda i: (0, 0)),
        out_shape=jax.ShapeDtypeStruct((O, mp_pad), jnp.float32),
        compiler_params=pltpu.CompilerParams(dimension_semantics=("arbitrary",)),
    )(patches, w, b, gamma, beta)


# --------------------------------------------------------------------------- #
# Kernel 2: fc1 + bias + ReLU + BatchNorm1d + fc2 + bias + Softmax(dim=1)
# --------------------------------------------------------------------------- #
def _head_kernel(x_ref, w1_ref, b1_ref, g_ref, bt_ref, w2_ref, b2_ref, o_ref):
    h = jnp.dot(x_ref[...], w1_ref[...], preferred_element_type=jnp.float32)  # (N, 20)
    h = jnp.maximum(h + b1_ref[...], 0.0)                                     # fc1 + ReLU
    mean = jnp.mean(h, axis=0, keepdims=True)                                 # BN1d batch stats
    hc = h - mean
    var = jnp.mean(hc * hc, axis=0, keepdims=True)
    h = hc * lax.rsqrt(var + 1e-5) * g_ref[...] + bt_ref[...]
    z = jnp.dot(h, w2_ref[...], preferred_element_type=jnp.float32) + b2_ref[...]  # fc2
    m = jnp.max(z, axis=-1, keepdims=True)                                    # softmax(dim=1)
    e = jnp.exp(z - m)
    o_ref[...] = e / jnp.sum(e, axis=-1, keepdims=True)                       # exact division


def head(x, w1, b1, gamma, beta, w2, b2):
    N = x.shape[0]
    arrs = (x, w1, b1, gamma, beta, w2, b2)
    return pl.pallas_call(
        _head_kernel,
        grid=(1,),
        in_specs=[pl.BlockSpec(a.shape, lambda i: (0, 0)) for a in arrs],
        out_specs=pl.BlockSpec((N, 3), lambda i: (0, 0)),
        out_shape=jax.ShapeDtypeStruct((N, 3), jnp.float32),
    )(*arrs)


# --------------------------------------------------------------------------- #
# Host-side glue (tiny XLA): padded im2col grouped by pool offset, bf16 early.
# --------------------------------------------------------------------------- #
def im2col_pool_groups(x_cm, kh, kw, pad):
    """x_cm: (C, N, H, W) channel-major -> patches (K_pad, 4*Mp_pad) bf16 (floor-mode pool)."""
    C, N, H, W = x_cm.shape
    xp = jnp.pad(x_cm, ((0, 0), (0, 0), (pad, pad), (pad, pad))).astype(jnp.bfloat16)
    Ho = H + 2 * pad - kh + 1
    Wo = W + 2 * pad - kw + 1
    Hop, Wop = Ho // 2, Wo // 2
    K = C * kh * kw
    Mp = N * Hop * Wop
    k_pad = _round_up(K, 128)
    mp_pad = _round_up(Mp, 128)
    # one shift per (i,j), already cropped to the floor-mode pool extent
    shifts = [xp[:, :, i:i + 2 * Hop, j:j + 2 * Wop] for i in range(kh) for j in range(kw)]
    p = jnp.stack(shifts, axis=1)                          # (C, kh*kw, N, 2Hop, 2Wop)
    p = p.reshape(C, kh * kw, N, Hop, 2, Wop, 2)
    p = p.transpose(0, 1, 4, 6, 2, 3, 5)                   # (C, khkw, dh, dw, N, Hop, Wop)
    p = p.reshape(K, 4, Mp)
    p = jnp.pad(p, ((0, k_pad - K), (0, 0), (0, mp_pad - Mp)))
    return p.reshape(k_pad, 4 * mp_pad), (K, k_pad, Mp, mp_pad, Hop, Wop)


def conv_relu_pool_bn(x_cm, w, b, gamma, beta, pad):
    """(C, N, H, W) -> (O, N, Hop, Wop): Conv(stride 1) + ReLU + MaxPool2x2 + BN2d."""
    C, N, H, W = x_cm.shape
    O, _, KH, KW = w.shape
    patches, (K, k_pad, Mp, mp_pad, Hop, Wop) = im2col_pool_groups(x_cm, KH, KW, pad)
    wm = jnp.pad(w.reshape(O, K), ((0, 0), (0, k_pad - K))).astype(jnp.bfloat16)
    y = conv_pool_bn(patches, wm, b.reshape(O, 1),
                     gamma.reshape(O, 1), beta.reshape(O, 1),
                     mp_pad=mp_pad, mp_valid=Mp)            # (O, Mp_pad) f32
    return y[:, :Mp].reshape(O, N, Hop, Wop)                # stay channel-major


# --------------------------------- Model ----------------------------------- #
def init_params(key, in_hw):
    h1 = in_hw                     # conv1 (k=5, p=2) keeps spatial size
    h1p = h1 // 2                  # maxpool
    h2 = h1p + 2 * 4 - 10 + 1      # conv2 (k=10, p=4)
    h2p = h2 // 2                  # maxpool
    flatten_dim = 8 * h2p * h2p
    ks = jax.random.split(key, 8)
    return {
        "w_conv1": jax.random.normal(ks[0], (4, 3, 5, 5), jnp.float32) * 0.1,
        "b_conv1": jax.random.normal(ks[1], (4,), jnp.float32) * 0.1,
        "w_conv2": jax.random.normal(ks[2], (8, 4, 10, 10), jnp.float32) * 0.05,
        "b_conv2": jax.random.normal(ks[3], (8,), jnp.float32) * 0.1,
        "w_fc1": jax.random.normal(ks[4], (20, flatten_dim), jnp.float32) * 0.05,
        "b_fc1": jax.random.normal(ks[5], (20,), jnp.float32) * 0.1,
        "w_fc2": jax.random.normal(ks[6], (3, 20), jnp.float32) * 0.1,
        "b_fc2": jax.random.normal(ks[7], (3,), jnp.float32) * 0.1,
        "bn1_g": jnp.ones((4,), jnp.float32), "bn1_b": jnp.zeros((4,), jnp.float32),
        "bn2_g": jnp.ones((8,), jnp.float32), "bn2_b": jnp.zeros((8,), jnp.float32),
        "bn3_g": jnp.ones((20,), jnp.float32), "bn3_b": jnp.zeros((20,), jnp.float32),
    }


def forward(p, x):
    x_cm = x.transpose(1, 0, 2, 3)                          # (C, N, H, W) channel-major
    # stage 1: Conv2d(3,4,5,p=2) + ReLU + MaxPool2d(2,2) + BatchNorm2d(4)
    y1 = conv_relu_pool_bn(x_cm, p["w_conv1"], p["b_conv1"], p["bn1_g"], p["bn1_b"], pad=2)
    # stage 2: Conv2d(4,8,10,p=4) + ReLU + MaxPool2d(2,2) + BatchNorm2d(8)
    y2 = conv_relu_pool_bn(y1, p["w_conv2"], p["b_conv2"], p["bn2_g"], p["bn2_b"], pad=4)
    # stage 3: Flatten -> Linear(.,20)+ReLU -> BatchNorm1d(20) -> Linear(20,3) -> Softmax(dim=1)
    O2, N = y2.shape[0], y2.shape[1]
    feats = y2.transpose(1, 0, 2, 3).reshape(N, -1)         # torch Flatten order (c, h, w)
    F = feats.shape[1]
    f_pad = _round_up(F, 128)                               # pad fc1 contraction dim
    feats = jnp.pad(feats, ((0, 0), (0, f_pad - F))).astype(jnp.bfloat16)
    w1 = jnp.pad(p["w_fc1"].T, ((0, f_pad - F), (0, 0))).astype(jnp.bfloat16)
    return head(feats, w1, p["b_fc1"].reshape(1, -1),
                p["bn3_g"].reshape(1, -1), p["bn3_b"].reshape(1, -1),
                p["w_fc2"].T, p["b_fc2"].reshape(1, -1))


if __name__ == "__main__":
    key = jax.random.PRNGKey(0)
    k_in, k_par = jax.random.split(key)
    # small input consistent with the module: NCHW, 3 input channels (batch>1 for BN1d)
    x1 = jax.random.normal(k_in, (2, 3, 32, 32), jnp.float32)
    params = init_params(k_par, in_hw=32)
    out = jax.jit(forward)(params, x1)
    out = jax.block_until_ready(out)
    assert out.shape == (2, 3)
    assert bool(jnp.all(jnp.isfinite(out)))
    print("KERNEL_OK")
</pallas_src>

<mosaic_0001>
module attributes {stable_mosaic.version = 11 : i64} {
  func.func @_conv_pool_bn_kernel(%arg0: i32, %arg1: memref<128x2048xbf16, #tpu.memory_space<vmem>>, %arg2: memref<4x128xbf16, #tpu.memory_space<vmem>>, %arg3: memref<4x1xf32, #tpu.memory_space<vmem>>, %arg4: memref<4x1xf32, #tpu.memory_space<vmem>>, %arg5: memref<4x1xf32, #tpu.memory_space<vmem>>, %arg6: memref<4x512xf32, #tpu.memory_space<vmem>>) attributes {dimension_semantics = [#tpu.dimension_semantics<arbitrary>], iteration_bounds = array<i64: 1>, scalar_prefetch = 0 : i64, scratch_operands = 0 : i64, tpu.core_type = #tpu.core_type<tc>, window_params = [{pipeline_mode = #tpu.pipeline_mode<synchronous>, transform_indices = @transform_0, window_bounds = array<i64: 128, 2048>}, {pipeline_mode = #tpu.pipeline_mode<synchronous>, transform_indices = @transform_1, window_bounds = array<i64: 4, 128>}, {pipeline_mode = #tpu.pipeline_mode<synchronous>, transform_indices = @transform_2, window_bounds = array<i64: 4, 1>}, {pipeline_mode = #tpu.pipeline_mode<synchronous>, transform_indices = @transform_3, window_bounds = array<i64: 4, 1>}, {pipeline_mode = #tpu.pipeline_mode<synchronous>, transform_indices = @transform_4, window_bounds = array<i64: 4, 1>}, {pipeline_mode = #tpu.pipeline_mode<synchronous>, transform_indices = @transform_5, window_bounds = array<i64: 4, 512>}]} {
    %c0 = arith.constant 0 : index
    %c0_0 = arith.constant 0 : index
    %0 = vector.load %arg2[%c0, %c0_0] : memref<4x128xbf16, #tpu.memory_space<vmem>>, vector<4x128xbf16>
    %c0_1 = arith.constant 0 : index
    %c0_2 = arith.constant 0 : index
    %1 = vector.load %arg1[%c0_1, %c0_2] : memref<128x2048xbf16, #tpu.memory_space<vmem>>, vector<128x2048xbf16>
    %cst = arith.constant dense<0.000000e+00> : vector<4x2048xf32>
    %2 = tpu.matmul %0, %1, %cst {dimension_numbers = #tpu.dot_dimension_numbers<[1], [0], [0], [1], [0, 0, 1, 1], [], []>} : vector<4x128xbf16>, vector<128x2048xbf16>, vector<4x2048xf32> -> vector<4x2048xf32>
    %c0_3 = arith.constant 0 : index
    %c0_4 = arith.constant 0 : index
    %3 = vector.load %arg3[%c0_3, %c0_4] : memref<4x1xf32, #tpu.memory_space<vmem>>, vector<4x1xf32>
    %4 = vector.broadcast %3 : vector<4x1xf32> to vector<4x2048xf32>
    %5 = arith.addf %2, %4 : vector<4x2048xf32>
    %cst_5 = arith.constant 0.000000e+00 : f32
    %6 = vector.broadcast %cst_5 : f32 to vector<4x2048xf32>
    %7 = arith.maximumf %5, %6 : vector<4x2048xf32>
    %8 = vector.extract_strided_slice %7 {offsets = [0, 0], sizes = [4, 512], strides = [1, 1]} : vector<4x2048xf32> to vector<4x512xf32>
    %9 = vector.extract_strided_slice %7 {offsets = [0, 512], sizes = [4, 512], strides = [1, 1]} : vector<4x2048xf32> to vector<4x512xf32>
    %10 = arith.maximumf %8, %9 : vector<4x512xf32>
    %11 = vector.extract_strided_slice %7 {offsets = [0, 1024], sizes = [4, 512], strides = [1, 1]} : vector<4x2048xf32> to vector<4x512xf32>
    %12 = vector.extract_strided_slice %7 {offsets = [0, 1536], sizes = [4, 512], strides = [1, 1]} : vector<4x2048xf32> to vector<4x512xf32>
    %13 = arith.maximumf %11, %12 : vector<4x512xf32>
    %14 = arith.maximumf %10, %13 : vector<4x512xf32>
    %cst_6 = arith.constant dense<0.000000e+00> : vector<4xf32>
    %15 = vector.multi_reduction <add>, %14, %cst_6 [1] : vector<4x512xf32> to vector<4xf32>
    %16 = vector.shape_cast %15 : vector<4xf32> to vector<4x1xf32>
    %cst_7 = arith.constant 5.120000e+02 : f32
    %17 = vector.broadcast %cst_7 : f32 to vector<4x1xf32>
    %18 = arith.divf %16, %17 : vector<4x1xf32>
    %19 = vector.broadcast %18 : vector<4x1xf32> to vector<4x512xf32>
    %20 = arith.subf %14, %19 : vector<4x512xf32>
    %21 = arith.mulf %20, %20 : vector<4x512xf32>
    %cst_8 = arith.constant dense<0.000000e+00> : vector<4xf32>
    %22 = vector.multi_reduction <add>, %21, %cst_8 [1] : vector<4x512xf32> to vector<4xf32>
    %23 = vector.shape_cast %22 : vector<4xf32> to vector<4x1xf32>
    %cst_9 = arith.constant 5.120000e+02 : f32
    %24 = vector.broadcast %cst_9 : f32 to vector<4x1xf32>
    %25 = arith.divf %23, %24 : vector<4x1xf32>
    %cst_10 = arith.constant 9.99999974E-6 : f32
    %26 = vector.broadcast %cst_10 : f32 to vector<4x1xf32>
    %27 = arith.addf %25, %26 : vector<4x1xf32>
    %28 = math.rsqrt %27 : vector<4x1xf32>
    %29 = vector.broadcast %28 : vector<4x1xf32> to vector<4x512xf32>
    %30 = arith.mulf %20, %29 : vector<4x512xf32>
    %c0_11 = arith.constant 0 : index
    %c0_12 = arith.constant 0 : index
    %31 = vector.load %arg4[%c0_11, %c0_12] : memref<4x1xf32, #tpu.memory_space<vmem>>, vector<4x1xf32>
    %32 = vector.broadcast %31 : vector<4x1xf32> to vector<4x512xf32>
    %33 = arith.mulf %30, %32 : vector<4x512xf32>
    %c0_13 = arith.constant 0 : index
    %c0_14 = arith.constant 0 : index
    %34 = vector.load %arg5[%c0_13, %c0_14] : memref<4x1xf32, #tpu.memory_space<vmem>>, vector<4x1xf32>
    %35 = vector.broadcast %34 : vector<4x1xf32> to vector<4x512xf32>
    %36 = arith.addf %33, %35 : vector<4x512xf32>
    %c0_15 = arith.constant 0 : index
    %c0_16 = arith.constant 0 : index
    %37 = vector.load %arg6[%c0_15, %c0_16] : memref<4x512xf32, #tpu.memory_space<vmem>>, vector<4x512xf32>
    tpu.vector_store %arg6[%c0_15, %c0_16], %36 {strides = array<i32>} : memref<4x512xf32, #tpu.memory_space<vmem>>, vector<4x512xf32>,
    return
  }
  func.func @transform_0(%arg0: i32) -> (i32, i32) {
    %c0_i32 = arith.constant 0 : i32
    %c0_i32_0 = arith.constant 0 : i32
    %c0_i32_1 = arith.constant 0 : i32
    return %c0_i32, %c0_i32_0 : i32, i32
  }
  func.func @transform_1(%arg0: i32) -> (i32, i32) {
    %c0_i32 = arith.constant 0 : i32
    %c0_i32_0 = arith.constant 0 : i32
    %c0_i32_1 = arith.constant 0 : i32
    return %c0_i32, %c0_i32_0 : i32, i32
  }
  func.func @transform_2(%arg0: i32) -> (i32, i32) {
    %c0_i32 = arith.constant 0 : i32
    %c0_i32_0 = arith.constant 0 : i32
    %c0_i32_1 = arith.constant 0 : i32
    return %c0_i32, %c0_i32_0 : i32, i32
  }
  func.func @transform_3(%arg0: i32) -> (i32, i32) {
    %c0_i32 = arith.constant 0 : i32
    %c0_i32_0 = arith.constant 0 : i32
    %c0_i32_1 = arith.constant 0 : i32
    return %c0_i32, %c0_i32_0 : i32, i32
  }
  func.func @transform_4(%arg0: i32) -> (i32, i32) {
    %c0_i32 = arith.constant 0 : i32
    %c0_i32_0 = arith.constant 0 : i32
    %c0_i32_1 = arith.constant 0 : i32
    return %c0_i32, %c0_i32_0 : i32, i32
  }
  func.func @transform_5(%arg0: i32) -> (i32, i32) {
    %c0_i32 = arith.constant 0 : i32
    %c0_i32_0 = arith.constant 0 : i32
    %c0_i32_1 = arith.constant 0 : i32
    return %c0_i32, %c0_i32_0 : i32, i32
  }
}

module attributes {stable_mosaic.version = 11 : i64} {
  func.func @_conv_pool_bn_kernel(%arg0: i32, %arg1: memref<512x512xbf16, #tpu.memory_space<vmem>>, %arg2: memref<8x512xbf16, #tpu.memory_space<vmem>>, %arg3: memref<8x1xf32, #tpu.memory_space<vmem>>, %arg4: memref<8x1xf32, #tpu.memory_space<vmem>>, %arg5: memref<8x1xf32, #tpu.memory_space<vmem>>, %arg6: memref<8x128xf32, #tpu.memory_space<vmem>>) attributes {dimension_semantics = [#tpu.dimension_semantics<arbitrary>], iteration_bounds = array<i64: 1>, scalar_prefetch = 0 : i64, scratch_operands = 0 : i64, tpu.core_type = #tpu.core_type<tc>, window_params = [{pipeline_mode = #tpu.pipeline_mode<synchronous>, transform_indices = @transform_0, window_bounds = array<i64: 512, 512>}, {pipeline_mode = #tpu.pipeline_mode<synchronous>, transform_indices = @transform_1, window_bounds = array<i64: 8, 512>}, {pipeline_mode = #tpu.pipeline_mode<synchronous>, transform_indices = @transform_2, window_bounds = array<i64: 8, 1>}, {pipeline_mode = #tpu.pipeline_mode<synchronous>, transform_indices = @transform_3, window_bounds = array<i64: 8, 1>}, {pipeline_mode = #tpu.pipeline_mode<synchronous>, transform_indices = @transform_4, window_bounds = array<i64: 8, 1>}, {pipeline_mode = #tpu.pipeline_mode<synchronous>, transform_indices = @transform_5, window_bounds = array<i64: 8, 128>}]} {
    %c0 = arith.constant 0 : index
    %c0_0 = arith.constant 0 : index
    %0 = vector.load %arg2[%c0, %c0_0] : memref<8x512xbf16, #tpu.memory_space<vmem>>, vector<8x512xbf16>
    %c0_1 = arith.constant 0 : index
    %c0_2 = arith.constant 0 : index
    %1 = vector.load %arg1[%c0_1, %c0_2] : memref<512x512xbf16, #tpu.memory_space<vmem>>, vector<512x512xbf16>
    %cst = arith.constant dense<0.000000e+00> : vector<8x512xf32>
    %2 = tpu.matmul %0, %1, %cst {dimension_numbers = #tpu.dot_dimension_numbers<[1], [0], [0], [1], [0, 0, 1, 1], [], []>} : vector<8x512xbf16>, vector<512x512xbf16>, vector<8x512xf32> -> vector<8x512xf32>
    %c0_3 = arith.constant 0 : index
    %c0_4 = arith.constant 0 : index
    %3 = vector.load %arg3[%c0_3, %c0_4] : memref<8x1xf32, #tpu.memory_space<vmem>>, vector<8x1xf32>
    %4 = vector.broadcast %3 : vector<8x1xf32> to vector<8x512xf32>
    %5 = arith.addf %2, %4 : vector<8x512xf32>
    %cst_5 = arith.constant 0.000000e+00 : f32
    %6 = vector.broadcast %cst_5 : f32 to vector<8x512xf32>
    %7 = arith.maximumf %5, %6 : vector<8x512xf32>
    %8 = vector.extract_strided_slice %7 {offsets = [0, 0], sizes = [8, 128], strides = [1, 1]} : vector<8x512xf32> to vector<8x128xf32>
    %9 = vector.extract_strided_slice %7 {offsets = [0, 128], sizes = [8, 128], strides = [1, 1]} : vector<8x512xf32> to vector<8x128xf32>
    %10 = arith.maximumf %8, %9 : vector<8x128xf32>
    %11 = vector.extract_strided_slice %7 {offsets = [0, 256], sizes = [8, 128], strides = [1, 1]} : vector<8x512xf32> to vector<8x128xf32>
    %12 = vector.extract_strided_slice %7 {offsets = [0, 384], sizes = [8, 128], strides = [1, 1]} : vector<8x512xf32> to vector<8x128xf32>
    %13 = arith.maximumf %11, %12 : vector<8x128xf32>
    %14 = arith.maximumf %10, %13 : vector<8x128xf32>
    %15 = tpu.iota {dimensions = array<i32: 1>} : vector<8x128xi32>
    %c98_i32 = arith.constant 98 : i32
    %16 = vector.broadcast %c98_i32 : i32 to vector<8x128xi32>
    %17 = arith.cmpi slt, %15, %16 : vector<8x128xi32>
    %cst_6 = arith.constant 0.000000e+00 : f32
    %18 = vector.broadcast %cst_6 : f32 to vector<8x128xf32>
    %19 = arith.select %17, %14, %18 : vector<8x128xi1>, vector<8x128xf32>
    %cst_7 = arith.constant dense<0.000000e+00> : vector<8xf32>
    %20 = vector.multi_reduction <add>, %19, %cst_7 [1] : vector<8x128xf32> to vector<8xf32>
    %21 = vector.shape_cast %20 : vector<8xf32> to vector<8x1xf32>
    %cst_8 = arith.constant 0.0102040814 : f32
    %22 = vector.broadcast %cst_8 : f32 to vector<8x1xf32>
    %23 = arith.mulf %21, %22 : vector<8x1xf32>
    %24 = vector.broadcast %23 : vector<8x1xf32> to vector<8x128xf32>
    %25 = arith.subf %14, %24 : vector<8x128xf32>
    %26 = arith.mulf %25, %25 : vector<8x128xf32>
    %cst_9 = arith.constant 0.000000e+00 : f32
    %27 = vector.broadcast %cst_9 : f32 to vector<8x128xf32>
    %28 = arith.select %17, %26, %27 : vector<8x128xi1>, vector<8x128xf32>
    %cst_10 = arith.constant dense<0.000000e+00> : vector<8xf32>
    %29 = vector.multi_reduction <add>, %28, %cst_10 [1] : vector<8x128xf32> to vector<8xf32>
    %30 = vector.shape_cast %29 : vector<8xf32> to vector<8x1xf32>
    %cst_11 = arith.constant 0.0102040814 : f32
    %31 = vector.broadcast %cst_11 : f32 to vector<8x1xf32>
    %32 = arith.mulf %30, %31 : vector<8x1xf32>
    %cst_12 = arith.constant 9.99999974E-6 : f32
    %33 = vector.broadcast %cst_12 : f32 to vector<8x1xf32>
    %34 = arith.addf %32, %33 : vector<8x1xf32>
    %35 = math.rsqrt %34 : vector<8x1xf32>
    %36 = vector.broadcast %35 : vector<8x1xf32> to vector<8x128xf32>
    %37 = arith.mulf %25, %36 : vector<8x128xf32>
    %c0_13 = arith.constant 0 : index
    %c0_14 = arith.constant 0 : index
    %38 = vector.load %arg4[%c0_13, %c0_14] : memref<8x1xf32, #tpu.memory_space<vmem>>, vector<8x1xf32>
    %39 = vector.broadcast %38 : vector<8x1xf32> to vector<8x128xf32>
    %40 = arith.mulf %37, %39 : vector<8x128xf32>
    %c0_15 = arith.constant 0 : index
    %c0_16 = arith.constant 0 : index
    %41 = vector.load %arg5[%c0_15, %c0_16] : memref<8x1xf32, #tpu.memory_space<vmem>>, vector<8x1xf32>
    %42 = vector.broadcast %41 : vector<8x1xf32> to vector<8x128xf32>
    %43 = arith.addf %40, %42 : vector<8x128xf32>
    %c0_17 = arith.constant 0 : index
    %c0_18 = arith.constant 0 : index
    %44 = vector.load %arg6[%c0_17, %c0_18] : memref<8x128xf32, #tpu.memory_space<vmem>>, vector<8x128xf32>
    tpu.vector_store %arg6[%c0_17, %c0_18], %43 {strides = array<i32>} : memref<8x128xf32, #tpu.memory_space<vmem>>, vector<8x128xf32>,
    return
  }
  func.func @transform_0(%arg0: i32) -> (i32, i32) {
    %c0_i32 = arith.constant 0 : i32
    %c0_i32_0 = arith.constant 0 : i32
    %c0_i32_1 = arith.constant 0 : i32
    return %c0_i32, %c0_i32_0 : i32, i32
  }
  func.func @transform_1(%arg0: i32) -> (i32, i32) {
    %c0_i32 = arith.constant 0 : i32
    %c0_i32_0 = arith.constant 0 : i32
    %c0_i32_1 = arith.constant 0 : i32
    return %c0_i32, %c0_i32_0 : i32, i32
  }
  func.func @transform_2(%arg0: i32) -> (i32, i32) {
    %c0_i32 = arith.constant 0 : i32
    %c0_i32_0 = arith.constant 0 : i32
    %c0_i32_1 = arith.constant 0 : i32
    return %c0_i32, %c0_i32_0 : i32, i32
  }
  func.func @transform_3(%arg0: i32) -> (i32, i32) {
    %c0_i32 = arith.constant 0 : i32
    %c0_i32_0 = arith.constant 0 : i32
    %c0_i32_1 = arith.constant 0 : i32
    return %c0_i32, %c0_i32_0 : i32, i32
  }
  func.func @transform_4(%arg0: i32) -> (i32, i32) {
    %c0_i32 = arith.constant 0 : i32
    %c0_i32_0 = arith.constant 0 : i32
    %c0_i32_1 = arith.constant 0 : i32
    return %c0_i32, %c0_i32_0 : i32, i32
  }
  func.func @transform_5(%arg0: i32) -> (i32, i32) {
    %c0_i32 = arith.constant 0 : i32
    %c0_i32_0 = arith.constant 0 : i32
    %c0_i32_1 = arith.constant 0 : i32
    return %c0_i32, %c0_i32_0 : i32, i32
  }
}

module attributes {stable_mosaic.version = 11 : i64} {
  func.func @_head_kernel(%arg0: i32, %arg1: memref<2x512xbf16, #tpu.memory_space<vmem>>, %arg2: memref<512x20xbf16, #tpu.memory_space<vmem>>, %arg3: memref<1x20xf32, #tpu.memory_space<vmem>>, %arg4: memref<1x20xf32, #tpu.memory_space<vmem>>, %arg5: memref<1x20xf32, #tpu.memory_space<vmem>>, %arg6: memref<20x3xf32, #tpu.memory_space<vmem>>, %arg7: memref<1x3xf32, #tpu.memory_space<vmem>>, %arg8: memref<2x3xf32, #tpu.memory_space<vmem>>) attributes {dimension_semantics = [#tpu.dimension_semantics<arbitrary>], iteration_bounds = array<i64: 1>, scalar_prefetch = 0 : i64, scratch_operands = 0 : i64, tpu.core_type = #tpu.core_type<tc>, window_params = [{pipeline_mode = #tpu.pipeline_mode<synchronous>, transform_indices = @transform_0, window_bounds = array<i64: 2, 512>}, {pipeline_mode = #tpu.pipeline_mode<synchronous>, transform_indices = @transform_1, window_bounds = array<i64: 512, 20>}, {pipeline_mode = #tpu.pipeline_mode<synchronous>, transform_indices = @transform_2, window_bounds = array<i64: 1, 20>}, {pipeline_mode = #tpu.pipeline_mode<synchronous>, transform_indices = @transform_3, window_bounds = array<i64: 1, 20>}, {pipeline_mode = #tpu.pipeline_mode<synchronous>, transform_indices = @transform_4, window_bounds = array<i64: 1, 20>}, {pipeline_mode = #tpu.pipeline_mode<synchronous>, transform_indices = @transform_5, window_bounds = array<i64: 20, 3>}, {pipeline_mode = #tpu.pipeline_mode<synchronous>, transform_indices = @transform_6, window_bounds = array<i64: 1, 3>}, {pipeline_mode = #tpu.pipeline_mode<synchronous>, transform_indices = @transform_7, window_bounds = array<i64: 2, 3>}]} {
    %c0 = arith.constant 0 : index
    %c0_0 = arith.constant 0 : index
    %0 = vector.load %arg1[%c0, %c0_0] : memref<2x512xbf16, #tpu.memory_space<vmem>>, vector<2x512xbf16>
    %c0_1 = arith.constant 0 : index
    %c0_2 = arith.constant 0 : index
    %1 = vector.load %arg2[%c0_1, %c0_2] : memref<512x20xbf16, #tpu.memory_space<vmem>>, vector<512x20xbf16>
    %cst = arith.constant dense<0.000000e+00> : vector<2x20xf32>
    %2 = tpu.matmul %0, %1, %cst {dimension_numbers = #tpu.dot_dimension_numbers<[1], [0], [0], [1], [0, 0, 1, 1], [], []>} : vector<2x512xbf16>, vector<512x20xbf16>, vector<2x20xf32> -> vector<2x20xf32>
    %c0_3 = arith.constant 0 : index
    %c0_4 = arith.constant 0 : index
    %3 = vector.load %arg3[%c0_3, %c0_4] : memref<1x20xf32, #tpu.memory_space<vmem>>, vector<1x20xf32>
    %4 = vector.broadcast %3 : vector<1x20xf32> to vector<2x20xf32>
    %5 = arith.addf %2, %4 : vector<2x20xf32>
    %cst_5 = arith.constant 0.000000e+00 : f32
    %6 = vector.broadcast %cst_5 : f32 to vector<2x20xf32>
    %7 = arith.maximumf %5, %6 : vector<2x20xf32>
    %cst_6 = arith.constant dense<0.000000e+00> : vector<20xf32>
    %8 = vector.multi_reduction <add>, %7, %cst_6 [0] : vector<2x20xf32> to vector<20xf32>
    %9 = vector.shape_cast %8 : vector<20xf32> to vector<1x20xf32>
    %cst_7 = arith.constant 2.000000e+00 : f32
    %10 = vector.broadcast %cst_7 : f32 to vector<1x20xf32>
    %11 = arith.divf %9, %10 : vector<1x20xf32>
    %12 = vector.broadcast %11 : vector<1x20xf32> to vector<2x20xf32>
    %13 = arith.subf %7, %12 : vector<2x20xf32>
    %14 = arith.mulf %13, %13 : vector<2x20xf32>
    %cst_8 = arith.constant dense<0.000000e+00> : vector<20xf32>
    %15 = vector.multi_reduction <add>, %14, %cst_8 [0] : vector<2x20xf32> to vector<20xf32>
    %16 = vector.shape_cast %15 : vector<20xf32> to vector<1x20xf32>
    %cst_9 = arith.constant 2.000000e+00 : f32
    %17 = vector.broadcast %cst_9 : f32 to vector<1x20xf32>
    %18 = arith.divf %16, %17 : vector<1x20xf32>
    %cst_10 = arith.constant 9.99999974E-6 : f32
    %19 = vector.broadcast %cst_10 : f32 to vector<1x20xf32>
    %20 = arith.addf %18, %19 : vector<1x20xf32>
    %21 = math.rsqrt %20 : vector<1x20xf32>
    %22 = vector.broadcast %21 : vector<1x20xf32> to vector<2x20xf32>
    %23 = arith.mulf %13, %22 : vector<2x20xf32>
    %c0_11 = arith.constant 0 : index
    %c0_12 = arith.constant 0 : index
    %24 = vector.load %arg4[%c0_11, %c0_12] : memref<1x20xf32, #tpu.memory_space<vmem>>, vector<1x20xf32>
    %25 = vector.broadcast %24 : vector<1x20xf32> to vector<2x20xf32>
    %26 = arith.mulf %23, %25 : vector<2x20xf32>
    %c0_13 = arith.constant 0 : index
    %c0_14 = arith.constant 0 : index
    %27 = vector.load %arg5[%c0_13, %c0_14] : memref<1x20xf32, #tpu.memory_space<vmem>>, vector<1x20xf32>
    %28 = vector.broadcast %27 : vector<1x20xf32> to vector<2x20xf32>
    %29 = arith.addf %26, %28 : vector<2x20xf32>
    %c0_15 = arith.constant 0 : index
    %c0_16 = arith.constant 0 : index
    %30 = vector.load %arg6[%c0_15, %c0_16] : memref<20x3xf32, #tpu.memory_space<vmem>>, vector<20x3xf32>
    %cst_17 = arith.constant dense<0.000000e+00> : vector<2x3xf32>
    %31 = tpu.matmul %29, %30, %cst_17 {dimension_numbers = #tpu.dot_dimension_numbers<[1], [0], [0], [1], [0, 0, 1, 1], [], []>} : vector<2x20xf32>, vector<20x3xf32>, vector<2x3xf32> -> vector<2x3xf32>
    %c0_18 = arith.constant 0 : index
    %c0_19 = arith.constant 0 : index
    %32 = vector.load %arg7[%c0_18, %c0_19] : memref<1x3xf32, #tpu.memory_space<vmem>>, vector<1x3xf32>
    %33 = vector.broadcast %32 : vector<1x3xf32> to vector<2x3xf32>
    %34 = arith.addf %31, %33 : vector<2x3xf32>
    %cst_20 = arith.constant dense<0xFF800000> : vector<2xf32>
    %35 = vector.multi_reduction <maximumf>, %34, %cst_20 [1] : vector<2x3xf32> to vector<2xf32>
    %36 = vector.shape_cast %35 : vector<2xf32> to vector<2x1xf32>
    %37 = vector.broadcast %36 : vector<2x1xf32> to vector<2x3xf32>
    %38 = arith.subf %34, %37 : vector<2x3xf32>
    %39 = math.exp %38 : vector<2x3xf32>
    %cst_21 = arith.constant dense<0.000000e+00> : vector<2xf32>
    %40 = vector.multi_reduction <add>, %39, %cst_21 [1] : vector<2x3xf32> to vector<2xf32>
    %41 = vector.shape_cast %40 : vector<2xf32> to vector<2x1xf32>
    %42 = vector.broadcast %41 : vector<2x1xf32> to vector<2x3xf32>
    %43 = arith.divf %39, %42 : vector<2x3xf32>
    %c0_22 = arith.constant 0 : index
    %c0_23 = arith.constant 0 : index
    %44 = vector.load %arg8[%c0_22, %c0_23] : memref<2x3xf32, #tpu.memory_space<vmem>>, vector<2x3xf32>
    tpu.vector_store %arg8[%c0_22, %c0_23], %43 {strides = array<i32>} : memref<2x3xf32, #tpu.memory_space<vmem>>, vector<2x3xf32>,
    return
  }
  func.func @transform_0(%arg0: i32) -> (i32, i32) {
    %c0_i32 = arith.constant 0 : i32
    %c0_i32_0 = arith.constant 0 : i32
    %c0_i32_1 = arith.constant 0 : i32
    return %c0_i32, %c0_i32_0 : i32, i32
  }
  func.func @transform_1(%arg0: i32) -> (i32, i32) {
    %c0_i32 = arith.constant 0 : i32
    %c0_i32_0 = arith.constant 0 : i32
    %c0_i32_1 = arith.constant 0 : i32
    return %c0_i32, %c0_i32_0 : i32, i32
  }
  func.func @transform_2(%arg0: i32) -> (i32, i32) {
    %c0_i32 = arith.constant 0 : i32
    %c0_i32_0 = arith.constant 0 : i32
    %c0_i32_1 = arith.constant 0 : i32
    return %c0_i32, %c0_i32_0 : i32, i32
  }
  func.func @transform_3(%arg0: i32) -> (i32, i32) {
    %c0_i32 = arith.constant 0 : i32
    %c0_i32_0 = arith.constant 0 : i32
    %c0_i32_1 = arith.constant 0 : i32
    return %c0_i32, %c0_i32_0 : i32, i32
  }
  func.func @transform_4(%arg0: i32) -> (i32, i32) {
    %c0_i32 = arith.constant 0 : i32
    %c0_i32_0 = arith.constant 0 : i32
    %c0_i32_1 = arith.constant 0 : i32
    return %c0_i32, %c0_i32_0 : i32, i32
  }
  func.func @transform_5(%arg0: i32) -> (i32, i32) {
    %c0_i32 = arith.constant 0 : i32
    %c0_i32_0 = arith.constant 0 : i32
    %c0_i32_1 = arith.constant 0 : i32
    return %c0_i32, %c0_i32_0 : i32, i32
  }
  func.func @transform_6(%arg0: i32) -> (i32, i32) {
    %c0_i32 = arith.constant 0 : i32
    %c0_i32_0 = arith.constant 0 : i32
    %c0_i32_1 = arith.constant 0 : i32
    return %c0_i32, %c0_i32_0 : i32, i32
  }
  func.func @transform_7(%arg0: i32) -> (i32, i32) {
    %c0_i32 = arith.constant 0 : i32
    %c0_i32_0 = arith.constant 0 : i32
    %c0_i32_1 = arith.constant 0 : i32
    return %c0_i32, %c0_i32_0 : i32, i32
  }
}

</mosaic_0001>

<bundles_post_ra>
// kernel: forward.3
= control target key start
LH: loop header
LB: loop body
LE: loop exit
PB: predicated region body
PF: predicated region fallthrough
CT: control target
= control target key end

     0   :  { %v1355_v3 = vmov 0   ;;  %vm1152_vm0 = vcmask 1043456   ;;  %s1816_s0 = inlined_call_operand.vmem [shape: bf16[128,2048], index: 0, kind: input, shape index: {}]   ;;  %s1817_s1 = inlined_call_operand.vmem [shape: bf16[4,128], index: 1, kind: input, shape index: {}]   ;;  %s1818_s2 = inlined_call_operand.vmem [shape: f32[4,1], index: 2, kind: input, shape index: {}]   ;;  %s1819_s3 = inlined_call_operand.vmem [shape: f32[4,1], index: 3, kind: input, shape index: {}]   ;;  %s1820_s4 = inlined_call_operand.vmem [shape: f32[4,1], index: 4, kind: input, shape index: {}]   ;;  %s1821_s5 = inlined_call_operand.vmem [shape: f32[4,512], index: 5, kind: output, shape index: {}]  }
   0x1   :  { %v134_v0 = vld [vmem:[%s1816_s0 + $0x380] sm:$0xff]  ;;  %v135_v2 = vld [vmem:[%s1816_s0 + $0x388] sm:$0xff]  ;;  %828 = vmatprep.mubr.bf16.mxu0 %v1355_v3  ;;  %869 = vmatprep.mubr.bf16.mxu1 %v1355_v3  ;;  %v136_v63 = vld [vmem:[%s1816_s0 + $0x390] sm:$0xff] }
   0x2   :  { %v142_v1 = vld [vmem:[%s1816_s0 + $0x3c0] sm:$0xff]  ;;  %v143_v5 = vld [vmem:[%s1816_s0 + $0x3c8] sm:$0xff]  ;;  %1351 = vset.pattern.permute.xlu0 %v1355_v3  ;;  %1352 = vset.pattern.permute.xlu1 %v1355_v3 }
   0x3   :  { %v1335_v4 = vcombine.high %v134_v0, %v142_v1  ;;  %v1334_v6 = vcombine.low %v134_v0, %v142_v1  ;;  %v118_v7 = vld [vmem:[%s1816_s0 + $0x300] sm:$0xff]  ;;  %v1337_v9 = vcombine.high %v135_v2, %v143_v5  ;;  %v1336_v10 = vcombine.low %v135_v2, %v143_v5  ;;  %v119_v12 = vld [vmem:[%s1816_s0 + $0x308] sm:$0xff]  ;;  %v144_v0 = vld [vmem:[%s1816_s0 + $0x3d0] sm:$0xff] }
   0x4   :  { %v126_v8 = vld [vmem:[%s1816_s0 + $0x340] sm:$0xff]  ;;  %v127_v13 = vld [vmem:[%s1816_s0 + $0x348] sm:$0xff]  ;;  %v137_v1 = vld [vmem:[%s1816_s0 + $0x398] sm:$0xff] }
   0x5   :  { %v1319_v11 = vcombine.high %v118_v7, %v126_v8  ;;  %v102_v14 = vld [vmem:[%s1816_s0 + $0x280] sm:$0xff]  ;;  %796 = vmatprep.subr.bf16.mxu0 %v1335_v4  ;;  %v1321_v15 = vcombine.high %v119_v12, %v127_v13  ;;  %v103_v17 = vld [vmem:[%s1816_s0 + $0x288] sm:$0xff]  ;;  %837 = vmatprep.subr.bf16.mxu1 %v1337_v9  ;;  %v1318_v19 = vcombine.low %v118_v7, %v126_v8  ;;  %v145_v2 = vld [vmem:[%s1816_s0 + $0x3d8] sm:$0xff] }
   0x6   :  { %v110_v16 = vld [vmem:[%s1816_s0 + $0x2c0] sm:$0xff]  ;;  %v111_v18 = vld [vmem:[%s1816_s0 + $0x2c8] sm:$0xff]  ;;  %797 = vmatpush1.bf16.msra.mxu0 %v1334_v6  ;;  %838 = vmatpush1.bf16.msra.mxu1 %v1336_v10  ;;  %v1320_v20 = vcombine.low %v119_v12, %v127_v13  ;;  %v1339_v6 = vcombine.high %v136_v63, %v144_v0  ;;  %v1341_v7 = vcombine.high %v137_v1, %v145_v2  ;;  %v120_v8 = vld [vmem:[%s1816_s0 + $0x310] sm:$0xff] }
   0x7   :  { %798 = vmatprep.subr.bf16.mxu0 %v1319_v11  ;;  %v1303_v21 = vcombine.high %v102_v14, %v110_v16  ;;  %839 = vmatprep.subr.bf16.mxu1 %v1321_v15  ;;  %v1305_v22 = vcombine.high %v103_v17, %v111_v18  ;;  %v86_v23 = vld [vmem:[%s1816_s0 + $0x200] sm:$0xff]  ;;  %v87_v25 = vld [vmem:[%s1816_s0 + $0x208] sm:$0xff]  ;;  %v1302_v27 = vcombine.low %v102_v14, %v110_v16  ;;  %v128_v9 = vld [vmem:[%s1816_s0 + $0x350] sm:$0xff] }
   0x8   :  { %v94_v24 = vld [vmem:[%s1816_s0 + $0x240] sm:$0xff]  ;;  %v95_v26 = vld [vmem:[%s1816_s0 + $0x248] sm:$0xff]  ;;  %v1304_v28 = vcombine.low %v103_v17, %v111_v18  ;;  %v121_v10 = vld [vmem:[%s1816_s0 + $0x318] sm:$0xff]  ;;  %v1338_v13 = vcombine.low %v136_v63, %v144_v0  ;;  %v1340_v14 = vcombine.low %v137_v1, %v145_v2  ;;  %v1323_v15 = vcombine.high %v120_v8, %v128_v9 }
   0x9   :  { %v1287_v29 = vcombine.high %v86_v23, %v94_v24  ;;  %v1289_v30 = vcombine.high %v87_v25, %v95_v26  ;;  %v70_v31 = vld [vmem:[%s1816_s0 + $0x180] sm:$0xff]  ;;  %v71_v33 = vld [vmem:[%s1816_s0 + $0x188] sm:$0xff]  ;;  %v1286_v35 = vcombine.low %v86_v23, %v94_v24  ;;  %v1288_v36 = vcombine.low %v87_v25, %v95_v26  ;;  %v129_v11 = vld [vmem:[%s1816_s0 + $0x358] sm:$0xff] }
   0xa   :  { %799 = vmatpush1.bf16.msra.mxu0 %v1318_v19  ;;  %840 = vmatpush1.bf16.msra.mxu1 %v1320_v20  ;;  %v78_v32 = vld [vmem:[%s1816_s0 + $0x1c0] sm:$0xff]  ;;  %v79_v34 = vld [vmem:[%s1816_s0 + $0x1c8] sm:$0xff]  ;;  %v1325_v16 = vcombine.high %v121_v10, %v129_v11  ;;  %v104_v17 = vld [vmem:[%s1816_s0 + $0x290] sm:$0xff]  ;;  %v1324_v23 = vcombine.low %v121_v10, %v129_v11 }
   0xb   :  { %800 = vmatprep.subr.bf16.mxu0 %v1303_v21  ;;  %841 = vmatprep.subr.bf16.mxu1 %v1305_v22  ;;  %v1271_v37 = vcombine.high %v70_v31, %v78_v32  ;;  %v1273_v38 = vcombine.high %v71_v33, %v79_v34  ;;  %v54_v39 = vld [vmem:[%s1816_s0 + $0x100] sm:$0xff]  ;;  %v55_v41 = vld [vmem:[%s1816_s0 + $0x108] sm:$0xff]  ;;  %v1270_v43 = vcombine.low %v70_v31, %v78_v32  ;;  %v112_v18 = vld [vmem:[%s1816_s0 + $0x2d0] sm:$0xff] }
   0xc   :  { %v62_v40 = vld [vmem:[%s1816_s0 + $0x140] sm:$0xff]  ;;  %v63_v42 = vld [vmem:[%s1816_s0 + $0x148] sm:$0xff]  ;;  %v1272_v44 = vcombine.low %v71_v33, %v79_v34  ;;  %v105_v19 = vld [vmem:[%s1816_s0 + $0x298] sm:$0xff]  ;;  %v1322_v21 = vcombine.low %v120_v8, %v128_v9  ;;  %v1307_v24 = vcombine.high %v104_v17, %v112_v18 }
   0xd   :  { %v1255_v45 = vcombine.high %v54_v39, %v62_v40  ;;  %v1257_v46 = vcombine.high %v55_v41, %v63_v42  ;;  %v38_v47 = vld [vmem:[%s1816_s0 + $0x80] sm:$0xff]  ;;  %v39_v49 = vld [vmem:[%s1816_s0 + $0x88] sm:$0xff]  ;;  %v1254_v51 = vcombine.low %v54_v39, %v62_v40  ;;  %v1256_v52 = vcombine.low %v55_v41, %v63_v42  ;;  %v113_v20 = vld [vmem:[%s1816_s0 + $0x2d8] sm:$0xff] }
   0xe   :  { %801 = vmatpush1.bf16.msra.mxu0 %v1302_v27  ;;  %842 = vmatpush1.bf16.msra.mxu1 %v1304_v28  ;;  %v46_v48 = vld [vmem:[%s1816_s0 + $0xc0] sm:$0xff]  ;;  %v47_v50 = vld [vmem:[%s1816_s0 + $0xc8] sm:$0xff]  ;;  %v1309_v25 = vcombine.high %v105_v19, %v113_v20  ;;  %v88_v26 = vld [vmem:[%s1816_s0 + $0x210] sm:$0xff]  ;;  %v1308_v31 = vcombine.low %v105_v19, %v113_v20 }
   0xf   :  { %802 = vmatprep.subr.bf16.mxu0 %v1287_v29  ;;  %843 = vmatprep.subr.bf16.mxu1 %v1289_v30  ;;  %v1239_v53 = vcombine.high %v38_v47, %v46_v48  ;;  %v1241_v54 = vcombine.high %v39_v49, %v47_v50  ;;  %v22_v55 = vld [vmem:[%s1816_s0] sm:$0xff]  ;;  %v23_v57 = vld [vmem:[%s1816_s0 + $0x8] sm:$0xff]  ;;  %v1238_v59 = vcombine.low %v38_v47, %v46_v48  ;;  %v96_v27 = vld [vmem:[%s1816_s0 + $0x250] sm:$0xff] }
  0x10   :  { %v30_v56 = vld [vmem:[%s1816_s0 + $0x40] sm:$0xff]  ;;  %v31_v58 = vld [vmem:[%s1816_s0 + $0x48] sm:$0xff]  ;;  %v1240_v60 = vcombine.low %v39_v49, %v47_v50  ;;  %v89_v28 = vld [vmem:[%s1816_s0 + $0x218] sm:$0xff]  ;;  %v1306_v30 = vcombine.low %v104_v17, %v112_v18  ;;  %v1291_v32 = vcombine.high %v88_v26, %v96_v27 }
  0x11   :  { %v1223_v61 = vcombine.high %v22_v55, %v30_v56  ;;  %v1225_v62 = vcombine.high %v23_v57, %v31_v58  ;;  %v1222_v4 = vcombine.low %v22_v55, %v30_v56  ;;  %v1224_v5 = vcombine.low %v23_v57, %v31_v58  ;;  %v1513_v12 = vld [vmem:[%s1817_s1] sm:$0x3]  ;;  %v97_v29 = vld [vmem:[%s1816_s0 + $0x258] sm:$0xff]  ;;  %v72_v34 = vld [vmem:[%s1816_s0 + $0x190] sm:$0xff] }
  0x12   :  { %803 = vmatpush1.bf16.msra.mxu0 %v1286_v35  ;;  %844 = vmatpush1.bf16.msra.mxu1 %v1288_v36  ;;  %v150_v22 = vld [vmem:[%s1818_s2] sm:$0xf]  ;;  %v1293_v33 = vcombine.high %v89_v28, %v97_v29  ;;  %v80_v35 = vld [vmem:[%s1816_s0 + $0x1d0] sm:$0xff]  ;;  %v73_v36 = vld [vmem:[%s1816_s0 + $0x198] sm:$0xff]  ;;  %v1292_v39 = vcombine.low %v89_v28, %v97_v29 }
  0x13   :  { %804 = vmatprep.subr.bf16.mxu0 %v1271_v37  ;;  %845 = vmatprep.subr.bf16.mxu1 %v1273_v38  ;;  %v81_v37 = vld [vmem:[%s1816_s0 + $0x1d8] sm:$0xff]  ;;  %v1290_v38 = vcombine.low %v88_v26, %v96_v27  ;;  %v1275_v40 = vcombine.high %v72_v34, %v80_v35  ;;  %v56_v42 = vld [vmem:[%s1816_s0 + $0x110] sm:$0xff]  ;;  %v138_v2 = vld [vmem:[%s1816_s0 + $0x3a0] sm:$0xff] }
  0x14   :  { %153 = vperm.xlu0 %1351, %v150_v22   ;;  %v1277_v41 = vcombine.high %v73_v36, %v81_v37  ;;  %v1276_v47 = vcombine.low %v73_v36, %v81_v37  ;;  %v40_v50 = vld [vmem:[%s1816_s0 + $0x90] sm:$0xff]  ;;  %v122_v11 = vld [vmem:[%s1816_s0 + $0x320] sm:$0xff]  ;;  %v107_v22 = vld [vmem:[%s1816_s0 + $0x2a8] sm:$0xff] }
  0x15   :  { %v24_v58 = vld [vmem:[%s1816_s0 + $0x10] sm:$0xff]  ;;  %v106_v20 = vld [vmem:[%s1816_s0 + $0x2a0] sm:$0xff] }
  0x16   :  { %805 = vmatpush1.bf16.msra.mxu0 %v1270_v43  ;;  %846 = vmatpush1.bf16.msra.mxu1 %v1272_v44  ;;  %v64_v43 = vld [vmem:[%s1816_s0 + $0x150] sm:$0xff]  ;;  %v57_v44 = vld [vmem:[%s1816_s0 + $0x118] sm:$0xff]  ;;  %v90_v28 = vld [vmem:[%s1816_s0 + $0x220] sm:$0xff] }
  0x17   :  { %806 = vmatprep.subr.bf16.mxu0 %v1255_v45  ;;  %847 = vmatprep.subr.bf16.mxu1 %v1257_v46  ;;  %v65_v45 = vld [vmem:[%s1816_s0 + $0x158] sm:$0xff]  ;;  %v1274_v46 = vcombine.low %v72_v34, %v80_v35  ;;  %v1259_v48 = vcombine.high %v56_v42, %v64_v43  ;;  %v98_v29 = vld [vmem:[%s1816_s0 + $0x260] sm:$0xff] }
  0x18   :  { %v1261_v49 = vcombine.high %v57_v44, %v65_v45  ;;  %v1260_v55 = vcombine.low %v57_v44, %v65_v45  ;;  %v1295_v34 = vcombine.high %v90_v28, %v98_v29  ;;  %v74_v36 = vld [vmem:[%s1816_s0 + $0x1a0] sm:$0xff] }
  0x19   :  { %v82_v37 = vld [vmem:[%s1816_s0 + $0x1e0] sm:$0xff] }
  0x1a   :  { %807 = vmatpush1.bf16.msra.mxu0 %v1254_v51  ;;  %848 = vmatpush1.bf16.msra.mxu1 %v1256_v52  ;;  %v48_v51 = vld [vmem:[%s1816_s0 + $0xd0] sm:$0xff]  ;;  %v41_v52 = vld [vmem:[%s1816_s0 + $0x98] sm:$0xff]  ;;  %v58_v44 = vld [vmem:[%s1816_s0 + $0x120] sm:$0xff] }
  0x1b   :  { %808 = vmatprep.subr.bf16.mxu0 %v1239_v53  ;;  %849 = vmatprep.subr.bf16.mxu1 %v1241_v54  ;;  %v49_v53 = vld [vmem:[%s1816_s0 + $0xd8] sm:$0xff]  ;;  %v1258_v54 = vcombine.low %v56_v42, %v64_v43  ;;  %v1243_v56 = vcombine.high %v40_v50, %v48_v51  ;;  %v1279_v42 = vcombine.high %v74_v36, %v82_v37  ;;  %v66_v45 = vld [vmem:[%s1816_s0 + $0x160] sm:$0xff] }
  0x1c   :  { %v1245_v57 = vcombine.high %v41_v52, %v49_v53  ;;  %v1244_v63 = vcombine.low %v41_v52, %v49_v53  ;;  %v42_v52 = vld [vmem:[%s1816_s0 + $0xa0] sm:$0xff] }
  0x1d   :  { %v50_v53 = vld [vmem:[%s1816_s0 + $0xe0] sm:$0xff] }
  0x1e   :  { %809 = vmatpush1.bf16.msra.mxu0 %v1238_v59  ;;  %850 = vmatpush1.bf16.msra.mxu1 %v1240_v60  ;;  %v32_v59 = vld [vmem:[%s1816_s0 + $0x50] sm:$0xff]  ;;  %v25_v60 = vld [vmem:[%s1816_s0 + $0x18] sm:$0xff] }
  0x1f   :  { %810 = vmatprep.subr.bf16.mxu0 %v1223_v61  ;;  %851 = vmatprep.subr.bf16.mxu1 %v1225_v62  ;;  %v33_v61 = vld [vmem:[%s1816_s0 + $0x58] sm:$0xff]  ;;  %v1242_v62 = vcombine.low %v40_v50, %v48_v51  ;;  %v1227_v0 = vcombine.high %v24_v58, %v32_v59  ;;  %v1263_v50 = vcombine.high %v58_v44, %v66_v45 }
  0x20   :  { %v1229_v1 = vcombine.high %v25_v60, %v33_v61  ;;  %v1228_v8 = vcombine.low %v25_v60, %v33_v61  ;;  %v26_v60 = vld [vmem:[%s1816_s0 + $0x20] sm:$0xff] }
  0x21   :  { %v34_v61 = vld [vmem:[%s1816_s0 + $0x60] sm:$0xff] }
  0x22   :  { %811 = vmatpush1.bf16.msra.mxu0 %v1222_v4  ;;  %852 = vmatpush1.bf16.msra.mxu1 %v1224_v5  ;;  %v146_v4 = vld [vmem:[%s1816_s0 + $0x3e0] sm:$0xff]  ;;  %v139_v5 = vld [vmem:[%s1816_s0 + $0x3a8] sm:$0xff] }
  0x23   :  { %878 = vmatprep.subr.bf16.mxu0 %v1339_v6  ;;  %919 = vmatprep.subr.bf16.mxu1 %v1341_v7  ;;  %v147_v6 = vld [vmem:[%s1816_s0 + $0x3e8] sm:$0xff]  ;;  %v1226_v7 = vcombine.low %v24_v58, %v32_v59  ;;  %v1343_v9 = vcombine.high %v138_v2, %v146_v4  ;;  %v1247_v58 = vcombine.high %v42_v52, %v50_v53 }
  0x24   :  { %v1345_v10 = vcombine.high %v139_v5, %v147_v6  ;;  %v1344_v17 = vcombine.low %v139_v5, %v147_v6  ;;  %v140_v5 = vld [vmem:[%s1816_s0 + $0x3b0] sm:$0xff] }
  0x25   :  { %829 = vmatmul.mubr.bf16.vlgmr.msra.gmra.mxu0 %v1513_v12  ;;  %870 = vmatmul.mubr.bf16.vlgmr.msra.gmra.mxu1 %v1513_v12  ;;  %v148_v6 = vld [vmem:[%s1816_s0 + $0x3f0] sm:$0xff] }
  0x26   :  { %879 = vmatpush1.bf16.msra.mxu0 %v1338_v13  ;;  %920 = vmatpush1.bf16.msra.mxu1 %v1340_v14  ;;  %v130_v13 = vld [vmem:[%s1816_s0 + $0x360] sm:$0xff]  ;;  %v123_v14 = vld [vmem:[%s1816_s0 + $0x328] sm:$0xff] }
  0x27   :  { %880 = vmatprep.subr.bf16.mxu0 %v1323_v15  ;;  %921 = vmatprep.subr.bf16.mxu1 %v1325_v16  ;;  %v131_v15 = vld [vmem:[%s1816_s0 + $0x368] sm:$0xff]  ;;  %v1342_v16 = vcombine.low %v138_v2, %v146_v4  ;;  %v1327_v18 = vcombine.high %v122_v11, %v130_v13  ;;  %v1231_v2 = vcombine.high %v26_v60, %v34_v61 }
  0x28   :  { %910 = vmatprep.mubr.bf16.mxu0 %v1355_v3  ;;  %951 = vmatprep.mubr.bf16.mxu1 %v1355_v3  ;;  %v1329_v19 = vcombine.high %v123_v14, %v131_v15 }
  0x2a   :  { %881 = vmatpush1.bf16.msra.mxu0 %v1322_v21  ;;  %922 = vmatpush1.bf16.msra.mxu1 %v1324_v23  ;;  %v114_v21 = vld [vmem:[%s1816_s0 + $0x2e0] sm:$0xff]  ;;  %v115_v23 = vld [vmem:[%s1816_s0 + $0x2e8] sm:$0xff] }
  0x2b   :  { %882 = vmatprep.subr.bf16.mxu0 %v1307_v24  ;;  %923 = vmatprep.subr.bf16.mxu1 %v1309_v25  ;;  %v1326_v24 = vcombine.low %v122_v11, %v130_v13  ;;  %v1328_v25 = vcombine.low %v123_v14, %v131_v15  ;;  %v1311_v26 = vcombine.high %v106_v20, %v114_v21  ;;  %v124_v14 = vld [vmem:[%s1816_s0 + $0x330] sm:$0xff] }
  0x2c   :  { %v1313_v27 = vcombine.high %v107_v22, %v115_v23  ;;  %v1347_v11 = vcombine.high %v140_v5, %v148_v6  ;;  %v132_v15 = vld [vmem:[%s1816_s0 + $0x370] sm:$0xff] }
  0x2e   :  { %883 = vmatpush1.bf16.msra.mxu0 %v1306_v30  ;;  %924 = vmatpush1.bf16.msra.mxu1 %v1308_v31  ;;  %v91_v30 = vld [vmem:[%s1816_s0 + $0x228] sm:$0xff] }
  0x2f   :  { %884 = vmatprep.subr.bf16.mxu0 %v1291_v32  ;;  %925 = vmatprep.subr.bf16.mxu1 %v1293_v33  ;;  %v99_v31 = vld [vmem:[%s1816_s0 + $0x268] sm:$0xff]  ;;  %v1310_v32 = vcombine.low %v106_v20, %v114_v21  ;;  %v1312_v33 = vcombine.low %v107_v22, %v115_v23  ;;  %v1331_v20 = vcombine.high %v124_v14, %v132_v15  ;;  %v108_v22 = vld [vmem:[%s1816_s0 + $0x2b0] sm:$0xff] }
  0x30   :  { %v1297_v35 = vcombine.high %v91_v30, %v99_v31  ;;  %v116_v23 = vld [vmem:[%s1816_s0 + $0x2f0] sm:$0xff] }
  0x32   :  { %885 = vmatpush1.bf16.msra.mxu0 %v1290_v38  ;;  %926 = vmatpush1.bf16.msra.mxu1 %v1292_v39  ;;  %v75_v38 = vld [vmem:[%s1816_s0 + $0x1a8] sm:$0xff] }
  0x33   :  { %886 = vmatprep.subr.bf16.mxu0 %v1275_v40  ;;  %927 = vmatprep.subr.bf16.mxu1 %v1277_v41  ;;  %v83_v39 = vld [vmem:[%s1816_s0 + $0x1e8] sm:$0xff]  ;;  %v1294_v40 = vcombine.low %v90_v28, %v98_v29  ;;  %v1296_v41 = vcombine.low %v91_v30, %v99_v31  ;;  %v1315_v28 = vcombine.high %v108_v22, %v116_v23  ;;  %v92_v30 = vld [vmem:[%s1816_s0 + $0x230] sm:$0xff] }
  0x34   :  { %v1281_v43 = vcombine.high %v75_v38, %v83_v39  ;;  %v100_v31 = vld [vmem:[%s1816_s0 + $0x270] sm:$0xff] }
  0x36   :  { %887 = vmatpush1.bf16.msra.mxu0 %v1274_v46  ;;  %928 = vmatpush1.bf16.msra.mxu1 %v1276_v47  ;;  %v59_v46 = vld [vmem:[%s1816_s0 + $0x128] sm:$0xff] }
  0x37   :  { %888 = vmatprep.subr.bf16.mxu0 %v1259_v48  ;;  %929 = vmatprep.subr.bf16.mxu1 %v1261_v49  ;;  %v67_v47 = vld [vmem:[%s1816_s0 + $0x168] sm:$0xff]  ;;  %v1278_v48 = vcombine.low %v74_v36, %v82_v37  ;;  %v1280_v49 = vcombine.low %v75_v38, %v83_v39  ;;  %v1299_v36 = vcombine.high %v92_v30, %v100_v31  ;;  %v76_v38 = vld [vmem:[%s1816_s0 + $0x1b0] sm:$0xff] }
  0x38   :  { %v1265_v51 = vcombine.high %v59_v46, %v67_v47  ;;  %v84_v39 = vld [vmem:[%s1816_s0 + $0x1f0] sm:$0xff] }
  0x3a   :  { %889 = vmatpush1.bf16.msra.mxu0 %v1258_v54  ;;  %930 = vmatpush1.bf16.msra.mxu1 %v1260_v55  ;;  %v43_v54 = vld [vmem:[%s1816_s0 + $0xa8] sm:$0xff] }
  0x3b   :  { %890 = vmatprep.subr.bf16.mxu0 %v1243_v56  ;;  %931 = vmatprep.subr.bf16.mxu1 %v1245_v57  ;;  %v51_v55 = vld [vmem:[%s1816_s0 + $0xe8] sm:$0xff]  ;;  %v1262_v56 = vcombine.low %v58_v44, %v66_v45  ;;  %v1264_v57 = vcombine.low %v59_v46, %v67_v47  ;;  %v60_v45 = vld [vmem:[%s1816_s0 + $0x130] sm:$0xff]  ;;  %v61_v47 = vld [vmem:[%s1816_s0 + $0x138] sm:$0xff] }
  0x3c   :  { %v1249_v59 = vcombine.high %v43_v54, %v51_v55  ;;  %v68_v46 = vld [vmem:[%s1816_s0 + $0x170] sm:$0xff] }
  0x3e   :  { %891 = vmatpush1.bf16.msra.mxu0 %v1242_v62  ;;  %932 = vmatpush1.bf16.msra.mxu1 %v1244_v63  ;;  %v27_v62 = vld [vmem:[%s1816_s0 + $0x28] sm:$0xff] }
  0x3f   :  { %892 = vmatprep.subr.bf16.mxu0 %v1227_v0  ;;  %933 = vmatprep.subr.bf16.mxu1 %v1229_v1  ;;  %v35_v63 = vld [vmem:[%s1816_s0 + $0x68] sm:$0xff]  ;;  %v1246_v0 = vcombine.low %v42_v52, %v50_v53  ;;  %v1248_v1 = vcombine.low %v43_v54, %v51_v55  ;;  %v44_v53 = vld [vmem:[%s1816_s0 + $0xb0] sm:$0xff]  ;;  %v45_v55 = vld [vmem:[%s1816_s0 + $0xb8] sm:$0xff] }
  0x40   :  { %v1233_v4 = vcombine.high %v27_v62, %v35_v63  ;;  %v52_v54 = vld [vmem:[%s1816_s0 + $0xf0] sm:$0xff] }
  0x42   :  { %893 = vmatpush1.bf16.msra.mxu0 %v1226_v7  ;;  %934 = vmatpush1.bf16.msra.mxu1 %v1228_v8  ;;  %v141_v7 = vld [vmem:[%s1816_s0 + $0x3b8] sm:$0xff] }
  0x43   :  { %960 = vmatprep.subr.bf16.mxu0 %v1343_v9  ;;  %1001 = vmatprep.subr.bf16.mxu1 %v1345_v10  ;;  %v149_v8 = vld [vmem:[%s1816_s0 + $0x3f8] sm:$0xff]  ;;  %v1230_v9 = vcombine.low %v26_v60, %v34_v61  ;;  %v1232_v10 = vcombine.low %v27_v62, %v35_v63  ;;  %v28_v61 = vld [vmem:[%s1816_s0 + $0x30] sm:$0xff] }
  0x44   :  { %v1349_v13 = vcombine.high %v141_v7, %v149_v8  ;;  %v36_v62 = vld [vmem:[%s1816_s0 + $0x70] sm:$0xff]  ;;  %v29_v63 = vld [vmem:[%s1816_s0 + $0x38] sm:$0xff] }
  0x45   :  { %911 = vmatmul.mubr.bf16.vlgmr.msra.gmra.mxu0 %v1513_v12  ;;  %952 = vmatmul.mubr.bf16.vlgmr.msra.gmra.mxu1 %v1513_v12 }
  0x46   :  { %961 = vmatpush1.bf16.msra.mxu0 %v1342_v16  ;;  %1002 = vmatpush1.bf16.msra.mxu1 %v1344_v17  ;;  %v125_v16 = vld [vmem:[%s1816_s0 + $0x338] sm:$0xff] }
  0x47   :  { %962 = vmatprep.subr.bf16.mxu0 %v1327_v18  ;;  %1003 = vmatprep.subr.bf16.mxu1 %v1329_v19  ;;  %v133_v17 = vld [vmem:[%s1816_s0 + $0x378] sm:$0xff]  ;;  %v1346_v18 = vcombine.low %v140_v5, %v148_v6  ;;  %v1348_v19 = vcombine.low %v141_v7, %v149_v8  ;;  %v1234_v6 = vcombine.low %v28_v61, %v36_v62  ;;  %v1188_v8 = vld [vmem:[%s1819_s3] sm:$0xf] }
  0x48   :  { %992 = vmatprep.mubr.bf16.mxu0 %v1355_v3  ;;  %1033 = vmatprep.mubr.bf16.mxu1 %v1355_v3  ;;  %v1333_v21 = vcombine.high %v125_v16, %v133_v17 }
  0x49   :  { %1191 = vperm.xlu1 %1352, %v1188_v8  }
  0x4a   :  { %963 = vmatpush1.bf16.msra.mxu0 %v1326_v24  ;;  %1004 = vmatpush1.bf16.msra.mxu1 %v1328_v25  ;;  %v109_v24 = vld [vmem:[%s1816_s0 + $0x2b8] sm:$0xff] }
  0x4b   :  { %964 = vmatprep.subr.bf16.mxu0 %v1311_v26  ;;  %1005 = vmatprep.subr.bf16.mxu1 %v1313_v27  ;;  %v117_v25 = vld [vmem:[%s1816_s0 + $0x2f8] sm:$0xff]  ;;  %v1330_v26 = vcombine.low %v124_v14, %v132_v15  ;;  %v1332_v27 = vcombine.low %v125_v16, %v133_v17 }
  0x4c   :  { %v1317_v29 = vcombine.high %v109_v24, %v117_v25 }
  0x4e   :  { %965 = vmatpush1.bf16.msra.mxu0 %v1310_v32  ;;  %1006 = vmatpush1.bf16.msra.mxu1 %v1312_v33  ;;  %v93_v32 = vld [vmem:[%s1816_s0 + $0x238] sm:$0xff] }
  0x4f   :  { %966 = vmatprep.subr.bf16.mxu0 %v1295_v34  ;;  %1007 = vmatprep.subr.bf16.mxu1 %v1297_v35  ;;  %v101_v33 = vld [vmem:[%s1816_s0 + $0x278] sm:$0xff]  ;;  %v1314_v34 = vcombine.low %v108_v22, %v116_v23  ;;  %v1316_v35 = vcombine.low %v109_v24, %v117_v25 }
  0x50   :  { %v1301_v37 = vcombine.high %v93_v32, %v101_v33 }
  0x52   :  { %967 = vmatpush1.bf16.msra.mxu0 %v1294_v40  ;;  %1008 = vmatpush1.bf16.msra.mxu1 %v1296_v41  ;;  %v85_v40 = vld [vmem:[%s1816_s0 + $0x1f8] sm:$0xff]  ;;  %v1298_v41 = vcombine.low %v92_v30, %v100_v31 }
  0x53   :  { %968 = vmatprep.subr.bf16.mxu0 %v1279_v42  ;;  %1009 = vmatprep.subr.bf16.mxu1 %v1281_v43  ;;  %v1300_v42 = vcombine.low %v93_v32, %v101_v33  ;;  %v1283_v43 = vcombine.high %v76_v38, %v84_v39 }
  0x56   :  { %969 = vmatpush1.bf16.msra.mxu0 %v1278_v48  ;;  %1010 = vmatpush1.bf16.msra.mxu1 %v1280_v49  ;;  %v69_v48 = vld [vmem:[%s1816_s0 + $0x178] sm:$0xff]  ;;  %v1282_v49 = vcombine.low %v76_v38, %v84_v39 }
  0x57   :  { %970 = vmatprep.subr.bf16.mxu0 %v1263_v50  ;;  %1011 = vmatprep.subr.bf16.mxu1 %v1265_v51  ;;  %v1267_v51 = vcombine.high %v60_v45, %v68_v46  ;;  %v1269_v52 = vcombine.high %v61_v47, %v69_v48 }
  0x5a   :  { %971 = vmatpush1.bf16.msra.mxu0 %v1262_v56  ;;  %1012 = vmatpush1.bf16.msra.mxu1 %v1264_v57  ;;  %v53_v56 = vld [vmem:[%s1816_s0 + $0xf8] sm:$0xff]  ;;  %v1266_v57 = vcombine.low %v60_v45, %v68_v46 }
  0x5b   :  { %972 = vmatprep.subr.bf16.mxu0 %v1247_v58  ;;  %1013 = vmatprep.subr.bf16.mxu1 %v1249_v59  ;;  %v1268_v58 = vcombine.low %v61_v47, %v69_v48  ;;  %v1251_v59 = vcombine.high %v44_v53, %v52_v54  ;;  %v1253_v60 = vcombine.high %v45_v55, %v53_v56 }
  0x5e   :  { %973 = vmatpush1.bf16.msra.mxu0 %v1246_v0  ;;  %1014 = vmatpush1.bf16.msra.mxu1 %v1248_v1  ;;  %v37_v0 = vld [vmem:[%s1816_s0 + $0x78] sm:$0xff]  ;;  %v1250_v1 = vcombine.low %v44_v53, %v52_v54 }
  0x5f   :  { %974 = vmatprep.subr.bf16.mxu0 %v1231_v2  ;;  %1015 = vmatprep.subr.bf16.mxu1 %v1233_v4  ;;  %v1252_v2 = vcombine.low %v45_v55, %v53_v56  ;;  %v1235_v4 = vcombine.high %v28_v61, %v36_v62  ;;  %v1237_v5 = vcombine.high %v29_v63, %v37_v0 }
  0x60   :  { %v1236_v7 = vcombine.low %v29_v63, %v37_v0 }
  0x62   :  { %975 = vmatpush1.bf16.msra.mxu0 %v1230_v9  ;;  %1016 = vmatpush1.bf16.msra.mxu1 %v1232_v10 }
  0x63   :  { %1042 = vmatprep.subr.bf16.mxu0 %v1347_v11  ;;  %1083 = vmatprep.subr.bf16.mxu1 %v1349_v13 }
  0x65   :  { %993 = vmatmul.mubr.bf16.vlgmr.msra.gmra.mxu0 %v1513_v12  ;;  %1034 = vmatmul.mubr.bf16.vlgmr.msra.gmra.mxu1 %v1513_v12 }
  0x66   :  { %1043 = vmatpush1.bf16.msra.mxu0 %v1346_v18  ;;  %1084 = vmatpush1.bf16.msra.mxu1 %v1348_v19 }
  0x67   :  { %1044 = vmatprep.subr.bf16.mxu0 %v1331_v20  ;;  %1085 = vmatprep.subr.bf16.mxu1 %v1333_v21 }
  0x68   :  { %1074 = vmatprep.mubr.bf16.mxu0 %v1355_v3  ;;  %1115 = vmatprep.mubr.bf16.mxu1 %v1355_v3  ;;  %v77_v3 = vld [vmem:[%s1816_s0 + $0x1b8] sm:$0xff] }
  0x69   :  { %v1285_v44 = vcombine.high %v77_v3, %v85_v40  ;;  %v1284_v50 = vcombine.low %v77_v3, %v85_v40 }
  0x6a   :  { %1045 = vmatpush1.bf16.msra.mxu0 %v1330_v26  ;;  %1086 = vmatpush1.bf16.msra.mxu1 %v1332_v27 }
  0x6b   :  { %1046 = vmatprep.subr.bf16.mxu0 %v1315_v28  ;;  %1087 = vmatprep.subr.bf16.mxu1 %v1317_v29 }
  0x6e   :  { %1047 = vmatpush1.bf16.msra.mxu0 %v1314_v34  ;;  %1088 = vmatpush1.bf16.msra.mxu1 %v1316_v35 }
  0x6f   :  { %1048 = vmatprep.subr.bf16.mxu0 %v1299_v36  ;;  %1089 = vmatprep.subr.bf16.mxu1 %v1301_v37 }
  0x72   :  { %1049 = vmatpush1.bf16.msra.mxu0 %v1298_v41  ;;  %1090 = vmatpush1.bf16.msra.mxu1 %v1300_v42 }
  0x73   :  { %1050 = vmatprep.subr.bf16.mxu0 %v1283_v43  ;;  %1091 = vmatprep.subr.bf16.mxu1 %v1285_v44 }
  0x76   :  { %1051 = vmatpush1.bf16.msra.mxu0 %v1282_v49  ;;  %1092 = vmatpush1.bf16.msra.mxu1 %v1284_v50 }
  0x77   :  { %1052 = vmatprep.subr.bf16.mxu0 %v1267_v51  ;;  %1093 = vmatprep.subr.bf16.mxu1 %v1269_v52 }
  0x7a   :  { %1053 = vmatpush1.bf16.msra.mxu0 %v1266_v57  ;;  %1094 = vmatpush1.bf16.msra.mxu1 %v1268_v58 }
  0x7b   :  { %1054 = vmatprep.subr.bf16.mxu0 %v1251_v59  ;;  %1095 = vmatprep.subr.bf16.mxu1 %v1253_v60 }
  0x7e   :  { %1055 = vmatpush1.bf16.msra.mxu0 %v1250_v1  ;;  %1096 = vmatpush1.bf16.msra.mxu1 %v1252_v2 }
  0x7f   :  { %1056 = vmatprep.subr.bf16.mxu0 %v1235_v4  ;;  %1097 = vmatprep.subr.bf16.mxu1 %v1237_v5 }
  0x82   :  { %1057 = vmatpush1.bf16.msra.mxu0 %v1234_v6  ;;  %1098 = vmatpush1.bf16.msra.mxu1 %v1236_v7 }
  0x85   :  { %1075 = vmatmul.mubr.bf16.vlgmr.msra.gmra.mxu0 %v1513_v12  ;;  %1116 = vmatmul.mubr.bf16.vlgmr.msra.gmra.mxu1 %v1513_v12 }
  0x8f   :  { %v154_v18 = vpop.permute.xlu0 %153 }
  0xe5   :  { %v830_v9 = vpop.f32.mrf.mxu0  ;;  %v871_v10 = vpop.f32.mrf.mxu1 }
  0xe6   :  { %v831_v19 = vadd.f32 %v830_v9, %v154_v18  ;;  %v872_v21 = vadd.f32 %v871_v10, %v154_v18 }
  0xe7   :  { %v832_v11 = vpop.f32.mrf.mxu0  ;;  %v873_v13 = vpop.f32.mrf.mxu1 }
  0xe8   :  { %v833_v22 = vadd.f32 %v832_v11, %v154_v18  ;;  %v874_v24 = vadd.f32 %v873_v13, %v154_v18  ;;  %v1124_v27 = vmax.f32 %v831_v19, 0.0  ;;  %v1126_v31 = vmax.f32 %v872_v21, 0.0 }
  0xe9   :  { %v834_v14 = vpop.f32.mrf.mxu0  ;;  %v875_v15 = vpop.f32.mrf.mxu1 }
  0xea   :  { %v1125_v35 = vmax.f32 %v833_v22, 0.0  ;;  %v1127_v39 = vmax.f32 %v874_v24, 0.0 }
  0xeb   :  { %v835_v16 = vpop.f32.mrf.mxu0  ;;  %v876_v17 = vpop.f32.mrf.mxu1 }
 0x105   :  { %v912_v20 = vpop.f32.mrf.mxu0  ;;  %v953_v12 = vpop.f32.mrf.mxu1 }
 0x106   :  { %v913_v23 = vadd.f32 %v912_v20, %v154_v18  ;;  %v954_v25 = vadd.f32 %v953_v12, %v154_v18 }
 0x107   :  { %v914_v26 = vpop.f32.mrf.mxu0  ;;  %v955_v30 = vpop.f32.mrf.mxu1 }
 0x108   :  { %v1128_v28 = vmax.f32 %v913_v23, 0.0  ;;  %v915_v29 = vadd.f32 %v914_v26, %v154_v18  ;;  %v1130_v32 = vmax.f32 %v954_v25, 0.0  ;;  %v956_v33 = vadd.f32 %v955_v30, %v154_v18 }
 0x109   :  { %v916_v34 = vpop.f32.mrf.mxu0  ;;  %v957_v38 = vpop.f32.mrf.mxu1 }
 0x10a   :  { %v1140_v36 = vmax.f32 %v1124_v27, %v1128_v28  ;;  %v1129_v37 = vmax.f32 %v915_v29, 0.0  ;;  %v1142_v3 = vmax.f32 %v1126_v31, %v1130_v32  ;;  %v1131_v40 = vmax.f32 %v956_v33, 0.0 }
 0x10b   :  { %v917_v41 = vpop.f32.mrf.mxu0  ;;  %v958_v43 = vpop.f32.mrf.mxu1 }
 0x10c   :  { %v1141_v42 = vmax.f32 %v1125_v35, %v1129_v37  ;;  %v1143_v44 = vmax.f32 %v1127_v39, %v1131_v40 }
 0x125   :  { %v994_v45 = vpop.f32.mrf.mxu0  ;;  %v1035_v46 = vpop.f32.mrf.mxu1 }
 0x126   :  { %v995_v53 = vadd.f32 %v994_v45, %v154_v18  ;;  %v1036_v54 = vadd.f32 %v1035_v46, %v154_v18  ;;  %v1198_v45 = vld [vmem:[%s1820_s4] sm:$0xf]  ;;  %v1192_v46 = vpop.permute.xlu1 %1191 }
 0x127   :  { %v996_v47 = vpop.f32.mrf.mxu0  ;;  %v1037_v48 = vpop.f32.mrf.mxu1 }
 0x128   :  { %v997_v56 = vadd.f32 %v996_v47, %v154_v18  ;;  %v1038_v59 = vadd.f32 %v1037_v48, %v154_v18  ;;  %v1132_v62 = vmax.f32 %v995_v53, 0.0  ;;  %v1134_v2 = vmax.f32 %v1036_v54, 0.0 }
 0x129   :  { %v998_v49 = vpop.f32.mrf.mxu0  ;;  %v1039_v50 = vpop.f32.mrf.mxu1 }
 0x12a   :  { %v1133_v7 = vmax.f32 %v997_v56, 0.0  ;;  %v1135_v11 = vmax.f32 %v1038_v59, 0.0 }
 0x12b   :  { %v999_v51 = vpop.f32.mrf.mxu0  ;;  %v1040_v52 = vpop.f32.mrf.mxu1 }
 0x145   :  { %v1076_v55 = vpop.f32.mrf.mxu0  ;;  %v1117_v58 = vpop.f32.mrf.mxu1 }
 0x146   :  { %v1077_v57 = vadd.f32 %v1076_v55, %v154_v18  ;;  %v1118_v60 = vadd.f32 %v1117_v58, %v154_v18 }
 0x147   :  { %v1078_v61 = vpop.f32.mrf.mxu0  ;;  %v1119_v1 = vpop.f32.mrf.mxu1 }
 0x148   :  { %v1136_v63 = vmax.f32 %v1077_v57, 0.0  ;;  %v1079_v0 = vadd.f32 %v1078_v61, %v154_v18  ;;  %v1138_v4 = vmax.f32 %v1118_v60, 0.0  ;;  %v1120_v5 = vadd.f32 %v1119_v1, %v154_v18 }
 0x149   :  { %v1080_v6 = vpop.f32.mrf.mxu0  ;;  %v1121_v10 = vpop.f32.mrf.mxu1 }
 0x14a   :  { %v1144_v8 = vmax.f32 %v1132_v62, %v1136_v63  ;;  %v1137_v9 = vmax.f32 %v1079_v0, 0.0  ;;  %v1146_v13 = vmax.f32 %v1134_v2, %v1138_v4  ;;  %v1139_v14 = vmax.f32 %v1120_v5, 0.0 }
 0x14b   :  { %v1081_v15 = vpop.f32.mrf.mxu0  ;;  %v1122_v19 = vpop.f32.mrf.mxu1 }
 0x14c   :  { %v1148_v16 = vmax.f32 %v1140_v36, %v1144_v8  ;;  %v1145_v17 = vmax.f32 %v1133_v7, %v1137_v9  ;;  %v1147_v20 = vmax.f32 %v1135_v11, %v1139_v14  ;;  %v1150_v21 = vmax.f32 %v1142_v3, %v1146_v13 }
 0x14e   :  { %v1149_v22 = vmax.f32 %v1141_v42, %v1145_v17  ;;  %v1151_v23 = vmax.f32 %v1143_v44, %v1147_v20  ;;  %v1153_v12 = vsel %vm1152_vm0, %v1148_v16, 0.0  ;;  %v1156_v25 = vsel %vm1152_vm0, %v1150_v21, 0.0 }
 0x150   :  { %v1154_v18 = vsel %vm1152_vm0, %v1149_v22, 0.0  ;;  %v1158_v27 = vsel %vm1152_vm0, %v1151_v23, 0.0 }
 0x151   :  { %v1155_v24 = vadd.f32 %v1154_v18, %v1153_v12 }
 0x153   :  { %v1157_v26 = vadd.f32 %v1156_v25, %v1155_v24 }
 0x155   :  { %v1159_v28 = vadd.f32 %v1158_v27, %v1157_v26 }
 0x157   :  { %1160 = vadd.xlane.f32.xlu0 %v1159_v28 }
 0x1e0   :  { %v1161_v29 = vpop.xlane.xlu0 %1160 }
 0x1e1   :  { %v1163_v30 = vmul.f32 0.001953125, %v1161_v29 }
 0x1e3   :  { %v1164_v31 = vsub.f32 %v1148_v16, %v1163_v30  ;;  %v1165_v32 = vsub.f32 %v1149_v22, %v1163_v30  ;;  %v1166_v33 = vsub.f32 %v1150_v21, %v1163_v30  ;;  %v1167_v34 = vsub.f32 %v1151_v23, %v1163_v30 }
 0x1e5   :  { %v1168_v35 = vmul.f32 %v1164_v31, %v1164_v31  ;;  %v1169_v36 = vmul.f32 %v1165_v32, %v1165_v32  ;;  %v1170_v37 = vmul.f32 %v1166_v33, %v1166_v33  ;;  %v1171_v38 = vmul.f32 %v1167_v34, %v1167_v34 }
 0x1e7   :  { %v1172_v39 = vsel %vm1152_vm0, %v1168_v35, 0.0  ;;  %v1173_v3 = vsel %vm1152_vm0, %v1169_v36, 0.0  ;;  %v1175_v41 = vsel %vm1152_vm0, %v1170_v37, 0.0  ;;  %v1177_v43 = vsel %vm1152_vm0, %v1171_v38, 0.0 }
 0x1e8   :  { %v1174_v40 = vadd.f32 %v1173_v3, %v1172_v39 }
 0x1ea   :  { %v1176_v42 = vadd.f32 %v1175_v41, %v1174_v40 }
 0x1ec   :  { %v1178_v44 = vadd.f32 %v1177_v43, %v1176_v42 }
 0x1ee   :  { %1179 = vadd.xlane.f32.xlu1 %v1178_v44 }
 0x1ff   :  { %1201 = vperm.xlu1 %1352, %v1198_v45  }
 0x277   :  { %v1180_v47 = vpop.xlane.xlu1 %1179 }
 0x278   :  { %v1181_v48 = vmul.f32 0.001953125, %v1180_v47 }
 0x27a   :  { %v1182_v49 = vadd.f32 1e-05, %v1181_v48 }
 0x27b   :  { %v1202_v59 = vpop.permute.xlu1 %1201 }
 0x27c   :  { %1353 = vrsqrt.f32 %v1182_v49 }
 0x289   :  { %v1354_v50 = vpop.eup %1353 }
 0x28a   :  { %v1184_v51 = vmul.f32 %v1354_v50, %v1164_v31  ;;  %v1185_v52 = vmul.f32 %v1354_v50, %v1165_v32  ;;  %v1186_v53 = vmul.f32 %v1354_v50, %v1166_v33  ;;  %v1187_v54 = vmul.f32 %v1354_v50, %v1167_v34 }
 0x28c   :  { %v1194_v55 = vmul.f32 %v1192_v46, %v1184_v51  ;;  %v1195_v56 = vmul.f32 %v1192_v46, %v1185_v52  ;;  %v1196_v57 = vmul.f32 %v1192_v46, %v1186_v53  ;;  %v1197_v58 = vmul.f32 %v1192_v46, %v1187_v54 }
 0x28e   :  { %v1204_v60 = vadd.f32 %v1202_v59, %v1194_v55  ;;  %v1205_v61 = vadd.f32 %v1202_v59, %v1195_v56  ;;  %v1206_v62 = vadd.f32 %v1202_v59, %v1196_v57  ;;  %v1207_v63 = vadd.f32 %v1202_v59, %v1197_v58 }
 0x290   :  { %v1212_v0 = vcombine.low %v1204_v60, %v1205_v61  ;;  %v1213_v1 = vcombine.low %v1206_v62, %v1207_v63 }
 0x292   :  { %1216 = vst [vmem:[%s1821_s5] sm:$0xff] %v1212_v0  ;;  %1217 = vst [vmem:[%s1821_s5 + $0x8] sm:$0xff] %v1213_v1 }

// kernel: forward.4
= control target key start
LH: loop header
LB: loop body
LE: loop exit
PB: predicated region body
PF: predicated region fallthrough
CT: control target
= control target key end

     0   :  { %v1349_v8 = vmov 0   ;;  %s1794_s0 = inlined_call_operand.vmem [shape: bf16[512,512], index: 0, kind: input, shape index: {}]   ;;  %s1795_s1 = inlined_call_operand.vmem [shape: bf16[8,512], index: 1, kind: input, shape index: {}]   ;;  %s1796_s2 = inlined_call_operand.vmem [shape: f32[8,1], index: 2, kind: input, shape index: {}]   ;;  %s1797_s3 = inlined_call_operand.vmem [shape: f32[8,1], index: 3, kind: input, shape index: {}]   ;;  %s1798_s4 = inlined_call_operand.vmem [shape: f32[8,1], index: 4, kind: input, shape index: {}]   ;;  %s1799_s5 = inlined_call_operand.vmem [shape: f32[8,128], index: 5, kind: output, shape index: {}]  }
   0x1   :  { %v1151_v0 = vld [vmem:[%s1794_s0 + $0xe4] ss:$16 sps:$4 sm:$0xff]   ;;  %v1155_v2 = vld [vmem:[%s1794_s0 + $0xe0] ss:$16 sps:$4 sm:$0xff]   ;;  %1149 = vset.pattern.permute.xlu0 %v1349_v8  ;;  %1150 = vset.pattern.permute.xlu1 %v1349_v8  ;;  %v21_v49 = vld [vmem:[%s1795_s1 + $0x8] sm:$0xff] }
   0x2   :  { %v1153_v1 = vld [vmem:[%s1794_s0 + $0x2e4] ss:$16 sps:$4 sm:$0xff]   ;;  %810 = vmatprep.subr.bf16.mxu0 %v1151_v0  ;;  %v1156_v3 = vld [vmem:[%s1794_s0 + $0x2e0] ss:$16 sps:$4 sm:$0xff]   ;;  %v1019_v52 = vcombine.high %v21_v49, %v21_v49  ;;  %v1589_v8 = vcombine.low %v21_v49, %v21_v49  ;;  %v1316_v49 = vld [vmem:[%s1794_s0 + $0x3ac] ss:$16 sps:$4 sm:$0xff]  }
   0x3   :  { %851 = vmatprep.subr.bf16.mxu1 %v1153_v1  ;;  %v1157_v4 = vld [vmem:[%s1794_s0 + $0xc4] ss:$16 sps:$4 sm:$0xff]   ;;  %811 = vmatpush1.bf16.msra.mxu0 %v1155_v2  ;;  %v1161_v6 = vld [vmem:[%s1794_s0 + $0xc0] ss:$16 sps:$4 sm:$0xff]  }
   0x4   :  { %852 = vmatpush1.bf16.msra.mxu1 %v1156_v3  ;;  %v1159_v5 = vld [vmem:[%s1794_s0 + $0x2c4] ss:$16 sps:$4 sm:$0xff]   ;;  %812 = vmatprep.subr.bf16.mxu0 %v1157_v4  ;;  %v1162_v7 = vld [vmem:[%s1794_s0 + $0x2c0] ss:$16 sps:$4 sm:$0xff]  }
   0x5   :  { %853 = vmatprep.subr.bf16.mxu1 %v1159_v5  ;;  %v1163_v9 = vld [vmem:[%s1794_s0 + $0xa4] ss:$16 sps:$4 sm:$0xff]   ;;  %v1167_v11 = vld [vmem:[%s1794_s0 + $0xa0] ss:$16 sps:$4 sm:$0xff]   ;;  %883 = vmatprep.mubr.bf16.mxu1 %v1019_v52  ;;  %v1253_v5 = vld [vmem:[%s1794_s0 + $0xec] ss:$16 sps:$4 sm:$0xff]  }
   0x6   :  { %v1165_v10 = vld [vmem:[%s1794_s0 + $0x2a4] ss:$16 sps:$4 sm:$0xff]   ;;  %v1168_v12 = vld [vmem:[%s1794_s0 + $0x2a0] ss:$16 sps:$4 sm:$0xff]  }
   0x7   :  { %813 = vmatpush1.bf16.msra.mxu0 %v1161_v6  ;;  %v1169_v13 = vld [vmem:[%s1794_s0 + $0x84] ss:$16 sps:$4 sm:$0xff]   ;;  %v1173_v15 = vld [vmem:[%s1794_s0 + $0x80] ss:$16 sps:$4 sm:$0xff]   ;;  %v1256_v6 = vld [vmem:[%s1794_s0 + $0x2ec] ss:$16 sps:$4 sm:$0xff]  }
   0x8   :  { %854 = vmatpush1.bf16.msra.mxu1 %v1162_v7  ;;  %814 = vmatprep.subr.bf16.mxu0 %v1163_v9  ;;  %v1171_v14 = vld [vmem:[%s1794_s0 + $0x284] ss:$16 sps:$4 sm:$0xff]   ;;  %v1174_v16 = vld [vmem:[%s1794_s0 + $0x280] ss:$16 sps:$4 sm:$0xff]   ;;  %v1251_v9 = vld [vmem:[%s1794_s0 + $0xe8] ss:$16 sps:$4 sm:$0xff]  }
   0x9   :  { %855 = vmatprep.subr.bf16.mxu1 %v1165_v10  ;;  %v1175_v17 = vld [vmem:[%s1794_s0 + $0x64] ss:$16 sps:$4 sm:$0xff]   ;;  %v1179_v19 = vld [vmem:[%s1794_s0 + $0x60] ss:$16 sps:$4 sm:$0xff]   ;;  %v1254_v10 = vld [vmem:[%s1794_s0 + $0x2e8] ss:$16 sps:$4 sm:$0xff]  }
   0xa   :  { %v1177_v18 = vld [vmem:[%s1794_s0 + $0x264] ss:$16 sps:$4 sm:$0xff]   ;;  %v1180_v20 = vld [vmem:[%s1794_s0 + $0x260] ss:$16 sps:$4 sm:$0xff]  }
   0xb   :  { %815 = vmatpush1.bf16.msra.mxu0 %v1167_v11  ;;  %v1181_v21 = vld [vmem:[%s1794_s0 + $0x44] ss:$16 sps:$4 sm:$0xff]   ;;  %v1185_v23 = vld [vmem:[%s1794_s0 + $0x40] ss:$16 sps:$4 sm:$0xff]   ;;  %v1259_v11 = vld [vmem:[%s1794_s0 + $0xcc] ss:$16 sps:$4 sm:$0xff]  }
   0xc   :  { %856 = vmatpush1.bf16.msra.mxu1 %v1168_v12  ;;  %816 = vmatprep.subr.bf16.mxu0 %v1169_v13  ;;  %v1183_v22 = vld [vmem:[%s1794_s0 + $0x244] ss:$16 sps:$4 sm:$0xff]   ;;  %v1186_v24 = vld [vmem:[%s1794_s0 + $0x240] ss:$16 sps:$4 sm:$0xff]   ;;  %v1262_v12 = vld [vmem:[%s1794_s0 + $0x2cc] ss:$16 sps:$4 sm:$0xff]  }
   0xd   :  { %857 = vmatprep.subr.bf16.mxu1 %v1171_v14  ;;  %v1187_v25 = vld [vmem:[%s1794_s0 + $0x24] ss:$16 sps:$4 sm:$0xff]   ;;  %v1191_v27 = vld [vmem:[%s1794_s0 + $0x20] ss:$16 sps:$4 sm:$0xff]   ;;  %v1257_v13 = vld [vmem:[%s1794_s0 + $0xc8] ss:$16 sps:$4 sm:$0xff]  }
   0xe   :  { %v1189_v26 = vld [vmem:[%s1794_s0 + $0x224] ss:$16 sps:$4 sm:$0xff]   ;;  %v1192_v28 = vld [vmem:[%s1794_s0 + $0x220] ss:$16 sps:$4 sm:$0xff]   ;;  %v1260_v14 = vld [vmem:[%s1794_s0 + $0x2c8] ss:$16 sps:$4 sm:$0xff]  }
   0xf   :  { %817 = vmatpush1.bf16.msra.mxu0 %v1173_v15  ;;  %v1193_v29 = vld [vmem:[%s1794_s0 + $0x4] ss:$16 sps:$4 sm:$0xff]   ;;  %v1197_v31 = vld [vmem:[%s1794_s0] ss:$16 sps:$4 sm:$0xff]   ;;  %v1265_v15 = vld [vmem:[%s1794_s0 + $0xac] ss:$16 sps:$4 sm:$0xff]  }
  0x10   :  { %858 = vmatpush1.bf16.msra.mxu1 %v1174_v16  ;;  %818 = vmatprep.subr.bf16.mxu0 %v1175_v17  ;;  %v1195_v30 = vld [vmem:[%s1794_s0 + $0x204] ss:$16 sps:$4 sm:$0xff]   ;;  %v1198_v32 = vld [vmem:[%s1794_s0 + $0x200] ss:$16 sps:$4 sm:$0xff]   ;;  %v1268_v16 = vld [vmem:[%s1794_s0 + $0x2ac] ss:$16 sps:$4 sm:$0xff]  }
  0x11   :  { %859 = vmatprep.subr.bf16.mxu1 %v1177_v18  ;;  %v1199_v33 = vld [vmem:[%s1794_s0 + $0x1e4] ss:$16 sps:$4 sm:$0xff]   ;;  %v1203_v35 = vld [vmem:[%s1794_s0 + $0x1e0] ss:$16 sps:$4 sm:$0xff]   ;;  %v1263_v17 = vld [vmem:[%s1794_s0 + $0xa8] ss:$16 sps:$4 sm:$0xff]  }
  0x12   :  { %v1201_v34 = vld [vmem:[%s1794_s0 + $0x3e4] ss:$16 sps:$4 sm:$0xff]   ;;  %v1204_v36 = vld [vmem:[%s1794_s0 + $0x3e0] ss:$16 sps:$4 sm:$0xff]   ;;  %v1266_v18 = vld [vmem:[%s1794_s0 + $0x2a8] ss:$16 sps:$4 sm:$0xff]  }
  0x13   :  { %819 = vmatpush1.bf16.msra.mxu0 %v1179_v19  ;;  %v1205_v37 = vld [vmem:[%s1794_s0 + $0x1c4] ss:$16 sps:$4 sm:$0xff]   ;;  %v1209_v39 = vld [vmem:[%s1794_s0 + $0x1c0] ss:$16 sps:$4 sm:$0xff]   ;;  %v1271_v19 = vld [vmem:[%s1794_s0 + $0x8c] ss:$16 sps:$4 sm:$0xff]  }
  0x14   :  { %860 = vmatpush1.bf16.msra.mxu1 %v1180_v20  ;;  %820 = vmatprep.subr.bf16.mxu0 %v1181_v21  ;;  %v1207_v38 = vld [vmem:[%s1794_s0 + $0x3c4] ss:$16 sps:$4 sm:$0xff]   ;;  %v1210_v40 = vld [vmem:[%s1794_s0 + $0x3c0] ss:$16 sps:$4 sm:$0xff]   ;;  %v1274_v20 = vld [vmem:[%s1794_s0 + $0x28c] ss:$16 sps:$4 sm:$0xff]  }
  0x15   :  { %861 = vmatprep.subr.bf16.mxu1 %v1183_v22  ;;  %v1211_v41 = vld [vmem:[%s1794_s0 + $0x1a4] ss:$16 sps:$4 sm:$0xff]   ;;  %v1215_v43 = vld [vmem:[%s1794_s0 + $0x1a0] ss:$16 sps:$4 sm:$0xff]   ;;  %v1269_v21 = vld [vmem:[%s1794_s0 + $0x88] ss:$16 sps:$4 sm:$0xff]  }
  0x16   :  { %v1213_v42 = vld [vmem:[%s1794_s0 + $0x3a4] ss:$16 sps:$4 sm:$0xff]   ;;  %v1216_v44 = vld [vmem:[%s1794_s0 + $0x3a0] ss:$16 sps:$4 sm:$0xff]   ;;  %v1272_v22 = vld [vmem:[%s1794_s0 + $0x288] ss:$16 sps:$4 sm:$0xff]  }
  0x17   :  { %821 = vmatpush1.bf16.msra.mxu0 %v1185_v23  ;;  %v1217_v45 = vld [vmem:[%s1794_s0 + $0x184] ss:$16 sps:$4 sm:$0xff]   ;;  %v1221_v50 = vld [vmem:[%s1794_s0 + $0x180] ss:$16 sps:$4 sm:$0xff]   ;;  %v1277_v23 = vld [vmem:[%s1794_s0 + $0x6c] ss:$16 sps:$4 sm:$0xff]  }
  0x18   :  { %862 = vmatpush1.bf16.msra.mxu1 %v1186_v24  ;;  %822 = vmatprep.subr.bf16.mxu0 %v1187_v25  ;;  %v1219_v46 = vld [vmem:[%s1794_s0 + $0x384] ss:$16 sps:$4 sm:$0xff]   ;;  %v1222_v51 = vld [vmem:[%s1794_s0 + $0x380] ss:$16 sps:$4 sm:$0xff]   ;;  %v1280_v24 = vld [vmem:[%s1794_s0 + $0x26c] ss:$16 sps:$4 sm:$0xff]  }
  0x19   :  { %863 = vmatprep.subr.bf16.mxu1 %v1189_v26  ;;  %v20_v47 = vld [vmem:[%s1795_s1] sm:$0xff]  ;;  %v1275_v25 = vld [vmem:[%s1794_s0 + $0x68] ss:$16 sps:$4 sm:$0xff]  }
  0x1a   :  { %v1521_v48 = vcombine.high %v20_v47, %v20_v47  ;;  %v1223_v53 = vld [vmem:[%s1794_s0 + $0x164] ss:$16 sps:$4 sm:$0xff]   ;;  %v1227_v55 = vld [vmem:[%s1794_s0 + $0x160] ss:$16 sps:$4 sm:$0xff]   ;;  %v1587_v7 = vcombine.low %v20_v47, %v20_v47  ;;  %v1278_v26 = vld [vmem:[%s1794_s0 + $0x268] ss:$16 sps:$4 sm:$0xff]  }
  0x1b   :  { %823 = vmatpush1.bf16.msra.mxu0 %v1191_v27  ;;  %v1225_v54 = vld [vmem:[%s1794_s0 + $0x364] ss:$16 sps:$4 sm:$0xff]   ;;  %v1228_v56 = vld [vmem:[%s1794_s0 + $0x360] ss:$16 sps:$4 sm:$0xff]   ;;  %v1283_v27 = vld [vmem:[%s1794_s0 + $0x4c] ss:$16 sps:$4 sm:$0xff]  }
  0x1c   :  { %864 = vmatpush1.bf16.msra.mxu1 %v1192_v28  ;;  %824 = vmatprep.subr.bf16.mxu0 %v1193_v29  ;;  %v1229_v57 = vld [vmem:[%s1794_s0 + $0x144] ss:$16 sps:$4 sm:$0xff]   ;;  %v1233_v59 = vld [vmem:[%s1794_s0 + $0x140] ss:$16 sps:$4 sm:$0xff]   ;;  %v1286_v28 = vld [vmem:[%s1794_s0 + $0x24c] ss:$16 sps:$4 sm:$0xff]  }
  0x1d   :  { %865 = vmatprep.subr.bf16.mxu1 %v1195_v30  ;;  %842 = vmatprep.mubr.bf16.mxu0 %v1521_v48  ;;  %v1231_v58 = vld [vmem:[%s1794_s0 + $0x344] ss:$16 sps:$4 sm:$0xff]   ;;  %v1234_v60 = vld [vmem:[%s1794_s0 + $0x340] ss:$16 sps:$4 sm:$0xff]   ;;  %v1281_v29 = vld [vmem:[%s1794_s0 + $0x48] ss:$16 sps:$4 sm:$0xff]  }
  0x1e   :  { %v1235_v61 = vld [vmem:[%s1794_s0 + $0x124] ss:$16 sps:$4 sm:$0xff]   ;;  %v1239_v63 = vld [vmem:[%s1794_s0 + $0x120] ss:$16 sps:$4 sm:$0xff]   ;;  %v1284_v30 = vld [vmem:[%s1794_s0 + $0x248] ss:$16 sps:$4 sm:$0xff]  }
  0x1f   :  { %825 = vmatpush1.bf16.msra.mxu0 %v1197_v31  ;;  %v1237_v62 = vld [vmem:[%s1794_s0 + $0x324] ss:$16 sps:$4 sm:$0xff]   ;;  %v1240_v0 = vld [vmem:[%s1794_s0 + $0x320] ss:$16 sps:$4 sm:$0xff]   ;;  %v1289_v31 = vld [vmem:[%s1794_s0 + $0x2c] ss:$16 sps:$4 sm:$0xff]  }
  0x20   :  { %866 = vmatpush1.bf16.msra.mxu1 %v1198_v32  ;;  %826 = vmatprep.subr.bf16.mxu0 %v1199_v33  ;;  %v1241_v1 = vld [vmem:[%s1794_s0 + $0x104] ss:$16 sps:$4 sm:$0xff]   ;;  %v1245_v3 = vld [vmem:[%s1794_s0 + $0x100] ss:$16 sps:$4 sm:$0xff]   ;;  %v1292_v32 = vld [vmem:[%s1794_s0 + $0x22c] ss:$16 sps:$4 sm:$0xff]  }
  0x21   :  { %867 = vmatprep.subr.bf16.mxu1 %v1201_v34  ;;  %v1243_v2 = vld [vmem:[%s1794_s0 + $0x304] ss:$16 sps:$4 sm:$0xff]   ;;  %v1246_v4 = vld [vmem:[%s1794_s0 + $0x300] ss:$16 sps:$4 sm:$0xff]   ;;  %v1287_v34 = vld [vmem:[%s1794_s0 + $0x28] ss:$16 sps:$4 sm:$0xff]  }
  0x22   :  { %v150_v33 = vld [vmem:[%s1796_s2] sm:$0xff]  ;;  %v1308_v47 = vld [vmem:[%s1794_s0 + $0x3c8] ss:$16 sps:$4 sm:$0xff]  }
  0x23   :  { %827 = vmatpush2.bf16.msra.mxu0 %v1203_v35  ;;  %153 = vperm.xlu0 %1149, %v150_v33   ;;  %v1290_v35 = vld [vmem:[%s1794_s0 + $0x228] ss:$16 sps:$4 sm:$0xff]  }
  0x24   :  { %868 = vmatpush2.bf16.msra.mxu1 %v1204_v36  ;;  %828 = vmatprep.subr.bf16.mxu0 %v1205_v37  ;;  %v1295_v36 = vld [vmem:[%s1794_s0 + $0xc] ss:$16 sps:$4 sm:$0xff]  }
  0x25   :  { %869 = vmatprep.subr.bf16.mxu1 %v1207_v38  ;;  %v1298_v37 = vld [vmem:[%s1794_s0 + $0x20c] ss:$16 sps:$4 sm:$0xff]   ;;  %v1293_v38 = vld [vmem:[%s1794_s0 + $0x8] ss:$16 sps:$4 sm:$0xff]  }
  0x27   :  { %829 = vmatpush2.bf16.msra.mxu0 %v1209_v39  ;;  %v1296_v39 = vld [vmem:[%s1794_s0 + $0x208] ss:$16 sps:$4 sm:$0xff]  }
  0x28   :  { %870 = vmatpush2.bf16.msra.mxu1 %v1210_v40  ;;  %830 = vmatprep.subr.bf16.mxu0 %v1211_v41  ;;  %v1301_v40 = vld [vmem:[%s1794_s0 + $0x1ec] ss:$16 sps:$4 sm:$0xff]  }
  0x29   :  { %871 = vmatprep.subr.bf16.mxu1 %v1213_v42  ;;  %v1304_v41 = vld [vmem:[%s1794_s0 + $0x3ec] ss:$16 sps:$4 sm:$0xff]   ;;  %v1299_v42 = vld [vmem:[%s1794_s0 + $0x1e8] ss:$16 sps:$4 sm:$0xff]  }
  0x2b   :  { %831 = vmatpush2.bf16.msra.mxu0 %v1215_v43  ;;  %v1302_v43 = vld [vmem:[%s1794_s0 + $0x3e8] ss:$16 sps:$4 sm:$0xff]  }
  0x2c   :  { %872 = vmatpush2.bf16.msra.mxu1 %v1216_v44  ;;  %832 = vmatprep.subr.bf16.mxu0 %v1217_v45  ;;  %v1307_v44 = vld [vmem:[%s1794_s0 + $0x1cc] ss:$16 sps:$4 sm:$0xff]  }
  0x2d   :  { %873 = vmatprep.subr.bf16.mxu1 %v1219_v46  ;;  %v1310_v45 = vld [vmem:[%s1794_s0 + $0x3cc] ss:$16 sps:$4 sm:$0xff]   ;;  %v1305_v46 = vld [vmem:[%s1794_s0 + $0x1c8] ss:$16 sps:$4 sm:$0xff]  }
  0x2f   :  { %833 = vmatpush2.bf16.msra.mxu0 %v1221_v50  ;;  %v1311_v50 = vld [vmem:[%s1794_s0 + $0x1a8] ss:$16 sps:$4 sm:$0xff]  }
  0x30   :  { %874 = vmatpush2.bf16.msra.mxu1 %v1222_v51  ;;  %834 = vmatprep.subr.bf16.mxu0 %v1223_v53  ;;  %v1314_v51 = vld [vmem:[%s1794_s0 + $0x3a8] ss:$16 sps:$4 sm:$0xff]   ;;  %v1322_v53 = vld [vmem:[%s1794_s0 + $0x38c] ss:$16 sps:$4 sm:$0xff]  }
  0x31   :  { %875 = vmatprep.subr.bf16.mxu1 %v1225_v54  ;;  %v1317_v54 = vld [vmem:[%s1794_s0 + $0x188] ss:$16 sps:$4 sm:$0xff]  }
  0x33   :  { %835 = vmatpush2.bf16.msra.mxu0 %v1227_v55  ;;  %v1320_v55 = vld [vmem:[%s1794_s0 + $0x388] ss:$16 sps:$4 sm:$0xff]  }
  0x34   :  { %876 = vmatpush2.bf16.msra.mxu1 %v1228_v56  ;;  %836 = vmatprep.subr.bf16.mxu0 %v1229_v57  ;;  %v1325_v56 = vld [vmem:[%s1794_s0 + $0x16c] ss:$16 sps:$4 sm:$0xff]  }
  0x35   :  { %877 = vmatprep.subr.bf16.mxu1 %v1231_v58  ;;  %v1328_v57 = vld [vmem:[%s1794_s0 + $0x36c] ss:$16 sps:$4 sm:$0xff]   ;;  %v1323_v58 = vld [vmem:[%s1794_s0 + $0x168] ss:$16 sps:$4 sm:$0xff]  }
  0x37   :  { %837 = vmatpush2.bf16.msra.mxu0 %v1233_v59  ;;  %v1326_v59 = vld [vmem:[%s1794_s0 + $0x368] ss:$16 sps:$4 sm:$0xff]  }
  0x38   :  { %878 = vmatpush2.bf16.msra.mxu1 %v1234_v60  ;;  %838 = vmatprep.subr.bf16.mxu0 %v1235_v61  ;;  %v1331_v60 = vld [vmem:[%s1794_s0 + $0x14c] ss:$16 sps:$4 sm:$0xff]  }
  0x39   :  { %879 = vmatprep.subr.bf16.mxu1 %v1237_v62  ;;  %v1334_v61 = vld [vmem:[%s1794_s0 + $0x34c] ss:$16 sps:$4 sm:$0xff]   ;;  %v1329_v62 = vld [vmem:[%s1794_s0 + $0x148] ss:$16 sps:$4 sm:$0xff]  }
  0x3b   :  { %839 = vmatpush2.bf16.msra.mxu0 %v1239_v63  ;;  %v1332_v63 = vld [vmem:[%s1794_s0 + $0x348] ss:$16 sps:$4 sm:$0xff]  }
  0x3c   :  { %880 = vmatpush2.bf16.msra.mxu1 %v1240_v0  ;;  %840 = vmatprep.subr.bf16.mxu0 %v1241_v1  ;;  %v1337_v0 = vld [vmem:[%s1794_s0 + $0x12c] ss:$16 sps:$4 sm:$0xff]  }
  0x3d   :  { %881 = vmatprep.subr.bf16.mxu1 %v1243_v2  ;;  %v1340_v1 = vld [vmem:[%s1794_s0 + $0x32c] ss:$16 sps:$4 sm:$0xff]   ;;  %v1335_v2 = vld [vmem:[%s1794_s0 + $0x128] ss:$16 sps:$4 sm:$0xff]  }
  0x3f   :  { %841 = vmatpush2.bf16.msra.mxu0 %v1245_v3  ;;  %v1338_v3 = vld [vmem:[%s1794_s0 + $0x328] ss:$16 sps:$4 sm:$0xff]  }
  0x40   :  { %882 = vmatpush2.bf16.msra.mxu1 %v1246_v4  ;;  %892 = vmatprep.subr.bf16.mxu0 %v1253_v5  ;;  %v1343_v4 = vld [vmem:[%s1794_s0 + $0x10c] ss:$16 sps:$4 sm:$0xff]  }
  0x41   :  { %933 = vmatprep.subr.bf16.mxu1 %v1256_v6  ;;  %v1346_v5 = vld [vmem:[%s1794_s0 + $0x30c] ss:$16 sps:$4 sm:$0xff]   ;;  %v1341_v6 = vld [vmem:[%s1794_s0 + $0x108] ss:$16 sps:$4 sm:$0xff]  }
  0x42   :  { %843 = vmatmul.mubr.bf16.vlgmr.msra.gmra.mxu0 %v1587_v7 }
  0x43   :  { %884 = vmatmul.mubr.bf16.vlgmr.msra.gmra.mxu1 %v1589_v8  ;;  %893 = vmatpush1.bf16.msra.mxu0 %v1251_v9  ;;  %v1344_v9 = vld [vmem:[%s1794_s0 + $0x308] ss:$16 sps:$4 sm:$0xff]  }
  0x44   :  { %934 = vmatpush1.bf16.msra.mxu1 %v1254_v10  ;;  %894 = vmatprep.subr.bf16.mxu0 %v1259_v11  ;;  %v997_v10 = vld [vmem:[%s1797_s3] sm:$0xff] }
  0x45   :  { %935 = vmatprep.subr.bf16.mxu1 %v1262_v12  ;;  %924 = vmatprep.mubr.bf16.mxu0 %v1521_v48  ;;  %v1313_v48 = vld [vmem:[%s1794_s0 + $0x1ac] ss:$16 sps:$4 sm:$0xff]  }
  0x46   :  { %965 = vmatprep.mubr.bf16.mxu1 %v1019_v52  ;;  %v1319_v52 = vld [vmem:[%s1794_s0 + $0x18c] ss:$16 sps:$4 sm:$0xff]   ;;  %1000 = vperm.xlu1 %1150, %v997_v10  }
  0x47   :  { %895 = vmatpush1.bf16.msra.mxu0 %v1257_v13 }
  0x48   :  { %936 = vmatpush1.bf16.msra.mxu1 %v1260_v14  ;;  %896 = vmatprep.subr.bf16.mxu0 %v1265_v15 }
  0x49   :  { %937 = vmatprep.subr.bf16.mxu1 %v1268_v16 }
  0x4b   :  { %897 = vmatpush1.bf16.msra.mxu0 %v1263_v17 }
  0x4c   :  { %938 = vmatpush1.bf16.msra.mxu1 %v1266_v18  ;;  %898 = vmatprep.subr.bf16.mxu0 %v1271_v19 }
  0x4d   :  { %939 = vmatprep.subr.bf16.mxu1 %v1274_v20 }
  0x4f   :  { %899 = vmatpush1.bf16.msra.mxu0 %v1269_v21 }
  0x50   :  { %940 = vmatpush1.bf16.msra.mxu1 %v1272_v22  ;;  %900 = vmatprep.subr.bf16.mxu0 %v1277_v23 }
  0x51   :  { %941 = vmatprep.subr.bf16.mxu1 %v1280_v24 }
  0x53   :  { %901 = vmatpush1.bf16.msra.mxu0 %v1275_v25 }
  0x54   :  { %942 = vmatpush1.bf16.msra.mxu1 %v1278_v26  ;;  %902 = vmatprep.subr.bf16.mxu0 %v1283_v27 }
  0x55   :  { %943 = vmatprep.subr.bf16.mxu1 %v1286_v28 }
  0x57   :  { %903 = vmatpush1.bf16.msra.mxu0 %v1281_v29 }
  0x58   :  { %944 = vmatpush1.bf16.msra.mxu1 %v1284_v30  ;;  %904 = vmatprep.subr.bf16.mxu0 %v1289_v31  ;;  %v981_v30 = vlaneseq }
  0x59   :  { %945 = vmatprep.subr.bf16.mxu1 %v1292_v32 }
  0x5b   :  { %905 = vmatpush1.bf16.msra.mxu0 %v1287_v34 }
  0x5c   :  { %946 = vmatpush1.bf16.msra.mxu1 %v1290_v35  ;;  %906 = vmatprep.subr.bf16.mxu0 %v1295_v36 }
  0x5d   :  { %947 = vmatprep.subr.bf16.mxu1 %v1298_v37 }
  0x5f   :  { %907 = vmatpush1.bf16.msra.mxu0 %v1293_v38  ;;  %v982_v38 = vand.u32 127, %v981_v30 }
  0x60   :  { %948 = vmatpush1.bf16.msra.mxu1 %v1296_v39  ;;  %908 = vmatprep.subr.bf16.mxu0 %v1301_v40 }
  0x61   :  { %949 = vmatprep.subr.bf16.mxu1 %v1304_v41  ;;  %vm983_vm0 = vcmp.lt.s32.totalorder %v982_v38, 98 }
  0x63   :  { %909 = vmatpush2.bf16.msra.mxu0 %v1299_v42 }
  0x64   :  { %950 = vmatpush2.bf16.msra.mxu1 %v1302_v43  ;;  %910 = vmatprep.subr.bf16.mxu0 %v1307_v44 }
  0x65   :  { %951 = vmatprep.subr.bf16.mxu1 %v1310_v45 }
  0x67   :  { %911 = vmatpush2.bf16.msra.mxu0 %v1305_v46 }
  0x68   :  { %952 = vmatpush2.bf16.msra.mxu1 %v1308_v47  ;;  %912 = vmatprep.subr.bf16.mxu0 %v1313_v48 }
  0x69   :  { %953 = vmatprep.subr.bf16.mxu1 %v1316_v49  ;;  %v1004_v49 = vld [vmem:[%s1798_s4] sm:$0xff] }
  0x6b   :  { %913 = vmatpush2.bf16.msra.mxu0 %v1311_v50 }
  0x6c   :  { %954 = vmatpush2.bf16.msra.mxu1 %v1314_v51  ;;  %914 = vmatprep.subr.bf16.mxu0 %v1319_v52 }
  0x6d   :  { %955 = vmatprep.subr.bf16.mxu1 %v1322_v53 }
  0x6f   :  { %915 = vmatpush2.bf16.msra.mxu0 %v1317_v54 }
  0x70   :  { %956 = vmatpush2.bf16.msra.mxu1 %v1320_v55  ;;  %916 = vmatprep.subr.bf16.mxu0 %v1325_v56 }
  0x71   :  { %957 = vmatprep.subr.bf16.mxu1 %v1328_v57 }
  0x73   :  { %917 = vmatpush2.bf16.msra.mxu0 %v1323_v58 }
  0x74   :  { %958 = vmatpush2.bf16.msra.mxu1 %v1326_v59  ;;  %918 = vmatprep.subr.bf16.mxu0 %v1331_v60 }
  0x75   :  { %959 = vmatprep.subr.bf16.mxu1 %v1334_v61 }
  0x77   :  { %919 = vmatpush2.bf16.msra.mxu0 %v1329_v62 }
  0x78   :  { %960 = vmatpush2.bf16.msra.mxu1 %v1332_v63  ;;  %920 = vmatprep.subr.bf16.mxu0 %v1337_v0 }
  0x79   :  { %961 = vmatprep.subr.bf16.mxu1 %v1340_v1 }
  0x7b   :  { %921 = vmatpush2.bf16.msra.mxu0 %v1335_v2 }
  0x7c   :  { %962 = vmatpush2.bf16.msra.mxu1 %v1338_v3  ;;  %922 = vmatprep.subr.bf16.mxu0 %v1343_v4 }
  0x7d   :  { %963 = vmatprep.subr.bf16.mxu1 %v1346_v5 }
  0x7f   :  { %923 = vmatpush2.bf16.msra.mxu0 %v1341_v6 }
  0x80   :  { %964 = vmatpush2.bf16.msra.mxu1 %v1344_v9 }
  0x82   :  { %925 = vmatmul.mubr.bf16.vlgmr.msra.gmra.mxu0 %v1587_v7 }
  0x83   :  { %966 = vmatmul.mubr.bf16.vlgmr.msra.gmra.mxu1 %v1589_v8 }
  0x9e   :  { %v154_v11 = vpop.permute.xlu0 %153 }
  0xc1   :  { %v1001_v50 = vpop.permute.xlu1 %1000 }
 0x102   :  { %v844_v12 = vpop.f32.mrf.mxu0 }
 0x103   :  { %v885_v13 = vpop.f32.mrf.mxu1  ;;  %v845_v14 = vadd.f32 %v844_v12, %v154_v11 }
 0x104   :  { %v846_v15 = vpop.f32.mrf.mxu0 }
 0x105   :  { %v887_v16 = vpop.f32.mrf.mxu1  ;;  %v847_v17 = vadd.f32 %v846_v15, %v154_v11  ;;  %v886_v18 = vadd.f32 %v885_v13, %v845_v14 }
 0x106   :  { %v848_v19 = vpop.f32.mrf.mxu0 }
 0x107   :  { %v889_v20 = vpop.f32.mrf.mxu1  ;;  %v888_v21 = vadd.f32 %v887_v16, %v847_v17  ;;  %v974_v22 = vmax.f32 %v886_v18, 0.0 }
 0x108   :  { %v849_v7 = vpop.f32.mrf.mxu0 }
 0x109   :  { %v890_v23 = vpop.f32.mrf.mxu1  ;;  %v975_v8 = vmax.f32 %v888_v21, 0.0 }
 0x10b   :  { %v978_v24 = vmax.f32 %v974_v22, %v975_v8 }
 0x142   :  { %v926_v25 = vpop.f32.mrf.mxu0 }
 0x143   :  { %v967_v26 = vpop.f32.mrf.mxu1  ;;  %v927_v27 = vadd.f32 %v926_v25, %v154_v11 }
 0x144   :  { %v928_v28 = vpop.f32.mrf.mxu0 }
 0x145   :  { %v969_v29 = vpop.f32.mrf.mxu1  ;;  %v968_v31 = vadd.f32 %v967_v26, %v927_v27  ;;  %v929_v32 = vadd.f32 %v928_v28, %v154_v11 }
 0x146   :  { %v930_v33 = vpop.f32.mrf.mxu0 }
 0x147   :  { %v971_v34 = vpop.f32.mrf.mxu1  ;;  %v970_v35 = vadd.f32 %v969_v29, %v929_v32  ;;  %v976_v39 = vmax.f32 %v968_v31, 0.0 }
 0x148   :  { %v931_v36 = vpop.f32.mrf.mxu0 }
 0x149   :  { %v972_v37 = vpop.f32.mrf.mxu1  ;;  %v977_v40 = vmax.f32 %v970_v35, 0.0 }
 0x14b   :  { %v979_v41 = vmax.f32 %v976_v39, %v977_v40 }
 0x14d   :  { %v980_v42 = vmax.f32 %v978_v24, %v979_v41 }
 0x14f   :  { %v984_v43 = vsel %vm983_vm0, %v980_v42, 0.0 }
 0x150   :  { %985 = vadd.xlane.f32.xlu0 %v984_v43 }
 0x1d9   :  { %v986_v44 = vpop.xlane.xlu0 %985 }
 0x1da   :  { %v987_v45 = vmul.f32 0.010204081, %v986_v44 }
 0x1dc   :  { %v988_v46 = vsub.f32 %v980_v42, %v987_v45 }
 0x1de   :  { %v989_v47 = vmul.f32 %v988_v46, %v988_v46 }
 0x1e0   :  { %v990_v48 = vsel %vm983_vm0, %v989_v47, 0.0 }
 0x1e1   :  { %991 = vadd.xlane.f32.xlu1 %v990_v48 }
 0x1f2   :  { %1007 = vperm.xlu1 %1150, %v1004_v49  }
 0x26a   :  { %v992_v51 = vpop.xlane.xlu1 %991 }
 0x26b   :  { %v993_v52 = vmul.f32 0.010204081, %v992_v51 }
 0x26d   :  { %v994_v53 = vadd.f32 1e-05, %v993_v52 }
 0x26e   :  { %v1008_v57 = vpop.permute.xlu1 %1007 }
 0x26f   :  { %1347 = vrsqrt.f32 %v994_v53 }
 0x27c   :  { %v1348_v54 = vpop.eup %1347 }
 0x27d   :  { %v996_v55 = vmul.f32 %v1348_v54, %v988_v46 }
 0x27f   :  { %v1003_v56 = vmul.f32 %v1001_v50, %v996_v55 }
 0x281   :  { %v1010_v58 = vadd.f32 %v1008_v57, %v1003_v56 }
 0x283   :  { %1011 = vst [vmem:[%s1799_s5] sm:$0xff] %v1010_v58 }

// kernel: forward.5
= control target key start
LH: loop header
LB: loop body
LE: loop exit
PB: predicated region body
PF: predicated region fallthrough
CT: control target
= control target key end

     0   :  { %v112_v30 = vlaneseq  ;;  %v716_v34 = vmov 1966171168   ;;  %s886_s0 = inlined_call_operand.vmem [shape: bf16[2,512], index: 0, kind: input, shape index: {}]   ;;  %s887_s1 = inlined_call_operand.vmem [shape: bf16[512,20], index: 1, kind: input, shape index: {}]   ;;  %s888_s2 = inlined_call_operand.vmem [shape: f32[1,20], index: 2, kind: input, shape index: {}]   ;;  %s889_s3 = inlined_call_operand.vmem [shape: f32[1,20], index: 3, kind: input, shape index: {}]   ;;  %s890_s4 = inlined_call_operand.vmem [shape: f32[1,20], index: 4, kind: input, shape index: {}]   ;;  %s891_s5 = inlined_call_operand.vmem [shape: f32[20,3], index: 5, kind: input, shape index: {}]   ;;  %s892_s6 = inlined_call_operand.vmem [shape: f32[1,3], index: 6, kind: input, shape index: {}]   ;;  %s893_s7 = inlined_call_operand.hbm [shape: f32[2,3], index: 7, kind: output, shape index: {}]  }
   0x1   :  { %v656_v0 = vld [vmem:[%s887_s1 + $0x78] sm:$0xff]   ;;  %v660_v4 = vld [vmem:[%s887_s1 + $0x70] sm:$0xff]   ;;  %v664_v8 = vld [vmem:[%s887_s1 + $0x68] sm:$0xff]   ;;  %v110_v35 = vunpack.c.l.s4 %v716_v34 }
   0x2   :  { %v657_v1 = vld [vmem:[%s887_s1 + $0xf8] sm:$0xff]   ;;  %595 = vmatprep.subr.bf16.mxu0 %v656_v0  ;;  %v661_v5 = vld [vmem:[%s887_s1 + $0xf0] sm:$0xff]   ;;  %v665_v9 = vld [vmem:[%s887_s1 + $0xe8] sm:$0xff]   ;;  %v113_v36 = vshrl.u32 %v112_v30, 7 }
   0x3   :  { %v658_v2 = vld [vmem:[%s887_s1 + $0x38] sm:$0xff]   ;;  %617 = vmatprep.subr.bf16.mxu1 %v657_v1  ;;  %v662_v6 = vld [vmem:[%s887_s1 + $0x30] sm:$0xff]   ;;  %v666_v10 = vld [vmem:[%s887_s1 + $0x28] sm:$0xff]  }
   0x4   :  { %v659_v3 = vld [vmem:[%s887_s1 + $0xb8] sm:$0xff]   ;;  %596 = vmatpush3.bf16.msra.mxu0 %v658_v2  ;;  %v663_v7 = vld [vmem:[%s887_s1 + $0xb0] sm:$0xff]   ;;  %v667_v11 = vld [vmem:[%s887_s1 + $0xa8] sm:$0xff]  }
   0x5   :  { %618 = vmatpush3.bf16.msra.mxu1 %v659_v3  ;;  %597 = vmatprep.subr.bf16.mxu0 %v660_v4  ;;  %v668_v12 = vld [vmem:[%s887_s1 + $0x60] sm:$0xff]   ;;  %v672_v16 = vld [vmem:[%s887_s1 + $0x58] sm:$0xff]   ;;  %v676_v20 = vld [vmem:[%s887_s1 + $0x50] sm:$0xff]  }
   0x6   :  { %619 = vmatprep.subr.bf16.mxu1 %v661_v5  ;;  %v669_v13 = vld [vmem:[%s887_s1 + $0xe0] sm:$0xff]   ;;  %v673_v17 = vld [vmem:[%s887_s1 + $0xd8] sm:$0xff]   ;;  %v677_v21 = vld [vmem:[%s887_s1 + $0xd0] sm:$0xff]  }
   0x7   :  { %v670_v14 = vld [vmem:[%s887_s1 + $0x20] sm:$0xff]   ;;  %v674_v18 = vld [vmem:[%s887_s1 + $0x18] sm:$0xff]   ;;  %v678_v22 = vld [vmem:[%s887_s1 + $0x10] sm:$0xff]  }
   0x8   :  { %598 = vmatpush3.bf16.msra.mxu0 %v662_v6  ;;  %v671_v15 = vld [vmem:[%s887_s1 + $0xa0] sm:$0xff]   ;;  %v675_v19 = vld [vmem:[%s887_s1 + $0x98] sm:$0xff]   ;;  %v679_v23 = vld [vmem:[%s887_s1 + $0x90] sm:$0xff]  }
   0x9   :  { %620 = vmatpush3.bf16.msra.mxu1 %v663_v7  ;;  %599 = vmatprep.subr.bf16.mxu0 %v664_v8  ;;  %v680_v24 = vld [vmem:[%s887_s1 + $0x48] sm:$0xff]   ;;  %v684_v28 = vld [vmem:[%s887_s1 + $0x40] sm:$0xff]  }
   0xa   :  { %621 = vmatprep.subr.bf16.mxu1 %v665_v9  ;;  %v681_v25 = vld [vmem:[%s887_s1 + $0xc8] sm:$0xff]   ;;  %v685_v29 = vld [vmem:[%s887_s1 + $0xc0] sm:$0xff]  }
   0xb   :  { %v682_v26 = vld [vmem:[%s887_s1 + $0x8] sm:$0xff]   ;;  %v686_v31 = vld [vmem:[%s887_s1] sm:$0xff]  }
   0xc   :  { %600 = vmatpush3.bf16.msra.mxu0 %v666_v10  ;;  %v683_v27 = vld [vmem:[%s887_s1 + $0x88] sm:$0xff]   ;;  %v687_v32 = vld [vmem:[%s887_s1 + $0x80] sm:$0xff]  }
   0xd   :  { %622 = vmatpush3.bf16.msra.mxu1 %v667_v11  ;;  %601 = vmatprep.subr.bf16.mxu0 %v668_v12  ;;  %v557_v33 = vld.sshfl [vmem:[%s886_s0] sm:$0x33 pattern:$0x75316420] }
   0xe   :  { %623 = vmatprep.subr.bf16.mxu1 %v669_v13 }
  0x10   :  { %602 = vmatpush3.bf16.msra.mxu0 %v670_v14 }
  0x11   :  { %624 = vmatpush3.bf16.msra.mxu1 %v671_v15  ;;  %603 = vmatprep.subr.bf16.mxu0 %v672_v16 }
  0x12   :  { %625 = vmatprep.subr.bf16.mxu1 %v673_v17 }
  0x14   :  { %604 = vmatpush3.bf16.msra.mxu0 %v674_v18 }
  0x15   :  { %626 = vmatpush3.bf16.msra.mxu1 %v675_v19  ;;  %605 = vmatprep.subr.bf16.mxu0 %v676_v20 }
  0x16   :  { %627 = vmatprep.subr.bf16.mxu1 %v677_v21 }
  0x18   :  { %606 = vmatpush3.bf16.msra.mxu0 %v678_v22 }
  0x19   :  { %628 = vmatpush3.bf16.msra.mxu1 %v679_v23  ;;  %607 = vmatprep.subr.bf16.mxu0 %v680_v24 }
  0x1a   :  { %629 = vmatprep.subr.bf16.mxu1 %v681_v25 }
  0x1c   :  { %608 = vmatpush3.bf16.msra.mxu0 %v682_v26 }
  0x1d   :  { %630 = vmatpush3.bf16.msra.mxu1 %v683_v27  ;;  %609 = vmatprep.subr.bf16.mxu0 %v684_v28 }
  0x1e   :  { %631 = vmatprep.subr.bf16.mxu1 %v685_v29 }
  0x20   :  { %610 = vmatpush3.bf16.msra.mxu0 %v686_v31 }
  0x21   :  { %632 = vmatpush3.bf16.msra.mxu1 %v687_v32 }
  0x22   :  { %12 = vsyncpa [#allocation3], 0  ;;  %v108_v37 = vcombine.high %v557_v33, %v557_v33  ;;  %v111_v38 = vunpack.c.0.s8 %v110_v35  ;;  %v717_v44 = vmov 0.0   ;;  %v443_v45 = vld [vmem:[%s891_s5 + $0x10] sm:$0xf]  ;;  %vm455_vm0 = vcmask 1043456  }
  0x23   :  { %643 = vmatprep.subr.mxu0 %v717_v44  ;;  %v442_v46 = vld [vmem:[%s891_s5 + $0x8] sm:$0xff]  ;;  %v441_v47 = vld [vmem:[%s891_s5] sm:$0xff]  ;;  %vm718_vm1 = vmmov 0   ;;  %vm402_vm2 = vcmask 156672   ;;  %vm451_vm3 = vcmask 162816   ;;  %vm529_vm4 = vcmask 17408  }
  0x24   :  { %v114_v39 = vsub.s32 %v111_v38, %v113_v36  ;;  %v556_v50 = vld [vmem:[%s888_s2] ss:$0 sm:$0xff] }
  0x25   :  { %v590_v18 = vld [vmem:[%s889_s3] ss:$0 sm:$0xff]  ;;  %s719_s3 = smov [#allocation2]  }
  0x26   :  { %v122_v40 = vrot.slane %v108_v37, %v114_v39  ;;  %v115_v41 = vrot.slane %v557_v33, %v114_v39  ;;  %v591_v20 = vld [vmem:[%s890_s4] ss:$0 sm:$0xff]  ;;  %s548_s4 = sshll.u32 %s719_s3, 4  ;;  %s549_s4 = int_to_ptr.vmem [resolvable:$true] %s548_s4 }
  0x27   :  { %v592_v23 = vld [vmem:[%s892_s6] ss:$0 sm:$0xff]  ;;  %s694_s6 = scalar_lea.vmem %s549_s4, 32  ;;  %p699_p1 = scmp.lt.s32.totalorder %s549_s4, %s549_s4 }
  0x28   :  { %353 = vmatprep.mubr.bf16.mxu0 %v122_v40  ;;  %v124_v42 = vcombine.high %v122_v40, %v122_v40  ;;  %v123_v43 = vcombine.high %v115_v41, %v115_v41  ;;  %p695_p0 = scmp.ne.s32.totalorder %s549_s4, %s694_s6  ;;  %p700_p2 = scmp.lt.s32.totalorder %s694_s6, %s694_s6 }
  0x29   :  { %354 = vmatmul.mubr.bf16.vlgmr.msra.gmra.mxu0 %v115_v41 }
  0x2a   :  { %393 = vmatprep.mubr.bf16.mxu1 %v124_v42  ;;  %644 = vmatpush3.msk.msra.mxu0 %vm455_vm0, %v443_v45  ;;  %p701_p3 = por %p700_p2, %p699_p1 }
  0x2b   :  { %394 = vmatmul.mubr.bf16.vlgmr.msra.gmra.mxu1 %v123_v43  ;;  %645 = vmatprep.subr.mxu0 %v717_v44 }
  0x2c   :  { %646 = vmatpush3.msra.mxu0 %v442_v46  ;;  %649 = vmatprep.mubr.msk.f32.mxu0 %vm718_vm1, %v717_v44  ;;  %p702_p4 = pnand %p701_p3, %p695_p0 }
  0x2d   :  { %647 = vmatprep.subr.mxu0 %v717_v44 }
  0x2e   :  { %648 = vmatpush3.msra.mxu0 %v441_v47 }
  0xe9   :  { %v611_v48 = vpop.f32.mrf.mxu0 }
  0xeb   :  { %v633_v49 = vpop.f32.mrf.mxu1  ;;  %v612_v51 = vpop.f32.mrf.mxu0 }
  0xec   :  { %v613_v52 = vadd.f32 %v612_v51, %v611_v48 }
  0xed   :  { %v634_v53 = vpop.f32.mrf.mxu1  ;;  %v614_v54 = vpop.f32.mrf.mxu0 }
  0xee   :  { %v356_v55 = vadd.f32 %v613_v52, %v556_v50  ;;  %v635_v56 = vadd.f32 %v634_v53, %v633_v49 }
  0xef   :  { %v636_v57 = vpop.f32.mrf.mxu1  ;;  %v615_v58 = vpop.f32.mrf.mxu0 }
  0xf0   :  { %v396_v59 = vadd.f32 %v635_v56, %v356_v55 }
  0xf1   :  { %v637_v60 = vpop.f32.mrf.mxu1 }
  0xf2   :  { %v401_v61 = vmax.f32 %v396_v59, 0.0 }
  0xf4   :  { %v403_v62 = vsel %vm402_vm2, %v401_v61, 0.0 }
  0xf5   :  { %v404_v63 = vrot.slane %v403_v62, 4 }
  0xf7   :  { %v405_v0 = vadd.f32 %v404_v63, %v403_v62 }
  0xf9   :  { %v406_v1 = vrot.slane %v405_v0, 2 }
  0xfb   :  { %v407_v2 = vadd.f32 %v406_v1, %v405_v0 }
  0xfd   :  { %v408_v3 = vrot.slane %v407_v2, 1 }
  0xff   :  { %v409_v4 = vadd.f32 %v408_v3, %v407_v2 }
 0x101   :  { %v411_v5 = vmul.f32 0.5, %v409_v4 }
 0x103   :  { %v412_v6 = vsub.f32 %v401_v61, %v411_v5 }
 0x105   :  { %v413_v7 = vmul.f32 %v412_v6, %v412_v6 }
 0x107   :  { %v414_v8 = vsel %vm402_vm2, %v413_v7, 0.0 }
 0x108   :  { %v415_v9 = vrot.slane %v414_v8, 4 }
 0x10a   :  { %v416_v10 = vadd.f32 %v415_v9, %v414_v8 }
 0x10c   :  { %v417_v11 = vrot.slane %v416_v10, 2 }
 0x10e   :  { %v418_v12 = vadd.f32 %v417_v11, %v416_v10 }
 0x110   :  { %v419_v13 = vrot.slane %v418_v12, 1 }
 0x112   :  { %v420_v14 = vadd.f32 %v419_v13, %v418_v12 }
 0x114   :  { %v421_v15 = vmul.f32 0.5, %v420_v14 }
 0x116   :  { %v422_v16 = vadd.f32 1e-05, %v421_v15 }
 0x118   :  { %688 = vrsqrt.f32 %v422_v16 }
 0x125   :  { %v689_v17 = vpop.eup %688 }
 0x126   :  { %v424_v19 = vmul.f32 %v689_v17, %v412_v6 }
 0x128   :  { %v432_v21 = vmul.f32 %v590_v18, %v424_v19 }
 0x12a   :  { %v440_v22 = vadd.f32 %v591_v20, %v432_v21 }
 0x12c   :  { %650 = vmatmul.mubr.msk.f32.vlgmr.msra.gmra.mxu0 %vm451_vm3, %v440_v22 }
 0x1ec   :  { %v525_v24 = vpop.f32.mrf.mxu0 }
 0x1ed   :  { %v526_v25 = vadd.f32 %v592_v23, %v525_v24 }
 0x1ee   :  { %v651_v26 = vpop.f32.mrf.mxu0 }
 0x1ef   :  { %v530_v27 = vsel %vm529_vm4, %v526_v25, -inf }
 0x1f0   :  { %531 = vmax.xlane.f32.xlu0 %v530_v27 }
 0x279   :  { %v532_v28 = vpop.xlane.xlu0 %531 }
 0x27a   :  { %v533_v29 = vsub.f32 %v526_v25, %v532_v28 }
 0x27c   :  { %v534_v30 = vmul.f32 1.442695, %v533_v29 }
 0x27e   :  { %690 = vpow2.f32 %v534_v30 }
 0x28b   :  { %v691_v31 = vpop.eup %690 }
 0x28c   :  { %v536_v32 = vsel %vm529_vm4, %v691_v31, 0.0 }
 0x28d   :  { %537 = vadd.xlane.f32.xlu0 %v536_v32 }
 0x316   :  { %v538_v33 = vpop.xlane.xlu0 %537 }
 0x317   :  { %692 = vrcp.f32 %v538_v33 }
 0x324   :  { %v693_v34 = vpop.eup %692 }
 0x325   :  { %v540_v35 = vmul.f32 %v693_v34, %v691_v31 }
 0x327   :  { %541 = vst.msk [vmem:[#allocation2] sm:$0x3] %vm529_vm4, %v540_v35 }
 0x328   :  { %705 = shalt.err (!%p702_p4)
}
 0x329   :  { %551 = dma.vmem_to_hbm [thread:$0]  %s549_s4, 32, %s893_s7, [#allocation3]  }
 0x32a   :  { %714 = dma.done.wait [#allocation3], 32  }
 0x32b   :  { %715 = vsyncadd [#allocation3], 4294967264 }
 0x32c   :  { %555 = vsyncpa [#allocation3], 1 }

</bundles_post_ra>
